<compile_context>
chip_gen: v6e
topology: v6e:2x2x1
jax: 0.10.0
libtpu: 0.0.40
codegen_flags: <defaults>
</compile_context>

<pallas_src>
import functools

import jax
import jax.numpy as jnp
from jax.experimental import pallas as pl
from jax.experimental.pallas import tpu as pltpu


def _round_up(v, m):
    return (v + m - 1) // m * m


def _vmem_capacity_bytes():
    """Per-core VMEM capacity; conservative fallback if the query fails."""
    try:
        info = pltpu.get_tpu_info()
        cap = getattr(info, "vmem_capacity_bytes", None)
        if cap:
            return int(cap)
    except Exception:
        pass
    return 64 * 1024 * 1024


def _inception_kernel(x_ref, mmask_ref, wb_ref, bb_ref, wf_ref, bf_ref,
                      o_ref, bnbuf, xbuf, slab, *, Wp, Cp, Cbp, L, M):
    xv = x_ref[0]                                       # (Cp, L) bf16
    mm = mmask_ref[...]                                 # (1, L) f32, 1 inside / 0 outside

    # ---- bottleneck 1x1 conv (+folded BN) + ReLU; exact zero outside interior ----
    bn = jnp.dot(wb_ref[...], xv, preferred_element_type=jnp.float32) + bb_ref[...]
    bn = jnp.maximum(bn, 0.0) * mm                      # (Cbp, L) f32

    # ---- margined bottleneck activation (only the small margins are zeroed) ----
    bnbuf[:, :M] = jnp.zeros((Cbp, M), bnbuf.dtype)
    bnbuf[:, M + L:] = jnp.zeros((Cbp, M), bnbuf.dtype)
    bnbuf[:, M:M + L] = bn.astype(jnp.bfloat16)

    # ---- margined input for max-pool; non-interior lanes pushed to -1e30 (-inf) ----
    pool_pad = ((mm - 1.0) * 1e30).astype(jnp.bfloat16)   # 0 inside, -1e30 outside
    xbuf[:, :M] = jnp.full((Cp, M), -1e30, xbuf.dtype)
    xbuf[:, M + L:] = jnp.full((Cp, M), -1e30, xbuf.dtype)
    xbuf[:, M:M + L] = xv + pool_pad

    # ---- conv5 + conv3 + conv1 as chunked im2col matmuls (5 taps / chunk, by oy) ----
    # Chunk g+1's sub-slab build (vld/vst/XLU slots) overlaps the MXU dot on chunk g
    # via the double-buffered slab; f32 accumulation across chunks.
    KC = 5 * Cbp
    acc = bf_ref[...]                                   # (3*Cp, 1) bias, broadcasts
    for g in range(5):
        slot = g & 1
        oy = g - 2
        for j in range(5):
            s = oy * Wp + (j - 2)
            slab[slot, j * Cbp:(j + 1) * Cbp, :] = bnbuf[:, M + s:M + s + L]
        acc = acc + jnp.dot(wf_ref[:, g * KC:(g + 1) * KC], slab[slot],
                            preferred_element_type=jnp.float32)
    # rows [0:Cp)=conv5, [Cp:2Cp)=conv3, [2Cp:3Cp)=conv1
    out = (jnp.maximum(acc[0:Cp], 0.0)
           + jnp.maximum(acc[Cp:2 * Cp], 0.0)
           + jnp.maximum(acc[2 * Cp:3 * Cp], 0.0))

    # ---- separable 3x3 max-pool (stride 1, pad 1) on the raw input ----
    h = jnp.maximum(jnp.maximum(xbuf[:, M - 1:M - 1 + L], xbuf[:, M:M + L]),
                    xbuf[:, M + 1:M + 1 + L])
    xbuf[:, M:M + L] = h                                # reuse margined buffer
    mp = jnp.maximum(jnp.maximum(xbuf[:, M - Wp:M - Wp + L], h),
                     xbuf[:, M + Wp:M + Wp + L])

    o_ref[0] = (out + mp.astype(jnp.float32)).astype(o_ref.dtype)


def _fold_bn(w_oihw, b, gamma, beta, mean, var, eps=1e-5):
    scale = gamma / jnp.sqrt(var + eps)
    w_f = w_oihw * scale[:, None, None, None]
    b_f = (b - mean) * scale + beta
    return w_f, b_f


def encoder_inception_forward(x_nchw, params, *, vmem_budget_bytes=None):
    N, C, H, W = x_nchw.shape
    assert C % 2 == 0
    Cb = C // 2
    Cp = max(_round_up(C, 8), 8)        # padded output channels (sublane tile)
    Cbp = max(_round_up(Cb, 8), 8)      # padded bottleneck channels
    Hp, Wp = H + 4, W + 4               # 2-pixel zero ring for the 5x5 conv
    HpWp = Hp * Wp
    HpWpL = _round_up(HpWp, 128)        # lane-dense per-image spatial extent
    M = 2 * Wp + 2                      # scratch margin; covers every tap shift

    # ---- generation-aware VMEM budgeting (64 MiB/TC v7x, 128 MiB v5e/v6e) ----
    cap = _vmem_capacity_bytes()
    if vmem_budget_bytes is None:
        vmem_budget_bytes = int(0.55 * cap)
    vmem_limit_bytes = min(cap - 20 * 1024 * 1024, 100 * 1024 * 1024)
    vmem_limit_bytes = max(vmem_limit_bytes, vmem_budget_bytes + 8 * 1024 * 1024)
    vmem_limit_bytes = max(vmem_limit_bytes, 32 * 1024 * 1024)

    def vmem_estimate(B):
        L = B * HpWpL
        KC = 5 * Cbp
        est = (2 * Cp * L * 2            # bf16 input block (double-buffered)
               + 2 * Cp * L * 4          # f32 output block (double-buffered)
               + Cbp * (L + 2 * M) * 2   # margined bottleneck scratch (bf16)
               + Cp * (L + 2 * M) * 2    # margined pool scratch (bf16)
               + 2 * KC * L * 2          # double-buffered im2col slab (bf16)
               + 3 * Cp * L * 4          # f32 fused-matmul accumulator
               + Cbp * L * 4             # bn intermediate (f32)
               + 2 * Cp * L * 4)         # pool / output temporaries
        return int(est * 1.25)           # safety factor for compiler temporaries

    # ---- images per grid step; cap B so Nb >= 2 (megacore + DMA pipelining) ----
    max_b = N if N < 2 else max(1, N // 2)
    B = 1
    for cand in range(max_b, 0, -1):
        if N % cand == 0 and vmem_estimate(cand) <= vmem_budget_bytes:
            B = cand
            break
    Nb = N // B
    L = B * HpWpL

    # ---- fold BatchNorm (eval / running-stats) into the conv weights ----
    (wb, bb), bnb = params['bottleneck']
    (w1, b1), bn1 = params['conv1']
    (w3, b3), bn3 = params['conv3']
    (w5, b5), bn5 = params['conv5']
    wbf, bbf = _fold_bn(wb, bb, *bnb)
    w1f, b1f = _fold_bn(w1, b1, *bn1)
    w3f, b3f = _fold_bn(w3, b3, *bn3)
    w5f, b5f = _fold_bn(w5, b5, *bn5)

    # bottleneck weight / bias, channel-padded
    wbk = jnp.zeros((Cbp, Cp), jnp.float32).at[:Cb, :C].set(wbf[:, :, 0, 0])
    bbk = jnp.zeros((Cbp, 1), jnp.float32).at[:Cb, 0].set(bbf)

    # fused conv weight: (3*Cp, 25*Cbp); tap t = (oy+2)*5 + (ox+2) (K-contiguous per oy)
    wfk = jnp.zeros((3 * Cp, 25 * Cbp), jnp.float32)
    for oy in range(-2, 3):
        for ox in range(-2, 3):
            t = (oy + 2) * 5 + (ox + 2)
            cols = slice(t * Cbp, t * Cbp + Cb)
            wfk = wfk.at[0:C, cols].set(w5f[:, :, oy + 2, ox + 2])
            if abs(oy) <= 1 and abs(ox) <= 1:
                wfk = wfk.at[Cp:Cp + C, cols].set(w3f[:, :, oy + 1, ox + 1])
            if oy == 0 and ox == 0:
                wfk = wfk.at[2 * Cp:2 * Cp + C, cols].set(w1f[:, :, 0, 0])
    bfk = (jnp.zeros((3 * Cp, 1), jnp.float32)
           .at[0:C, 0].set(b5f)
           .at[Cp:Cp + C, 0].set(b3f)
           .at[2 * Cp:2 * Cp + C, 0].set(b1f))

    wbk = wbk.astype(jnp.bfloat16)
    wfk = wfk.astype(jnp.bfloat16)

    # ---- pad input into (Cp, Hp*Wp) per-image layout; bf16 to halve input DMA ----
    xp = jnp.pad(x_nchw.astype(jnp.float32),
                 ((0, 0), (0, Cp - C), (2, 2), (2, 2))).reshape(N, Cp, HpWp)
    xp = jnp.pad(xp, ((0, 0), (0, 0), (0, HpWpL - HpWp))).astype(jnp.bfloat16)
    if B == 1:
        xk = xp                                          # no host-side transpose
    else:
        xk = xp.reshape(Nb, B, Cp, HpWpL).transpose(0, 2, 1, 3).reshape(Nb, Cp, L)

    # per-lane validity mask (image interior), shared across all grid steps
    q = jnp.arange(HpWpL)
    r, c = q // Wp, q % Wp
    valid = (q < HpWp) & (r >= 2) & (r < 2 + H) & (c >= 2) & (c < 2 + W)
    if B > 1:
        valid = jnp.tile(valid, (B,))
    mmask = valid.astype(jnp.float32).reshape(1, L)      # 1 inside, 0 outside

    kernel = functools.partial(_inception_kernel, Wp=Wp, Cp=Cp, Cbp=Cbp, L=L, M=M)

    def full_spec(a):
        nd = a.ndim
        return pl.BlockSpec(a.shape, lambda n, _nd=nd: (0,) * _nd)

    out = pl.pallas_call(
        kernel,
        out_shape=jax.ShapeDtypeStruct((Nb, Cp, L), jnp.float32),
        grid_spec=pltpu.PrefetchScalarGridSpec(
            num_scalar_prefetch=0,
            grid=(Nb,),
            in_specs=[
                pl.BlockSpec((1, Cp, L), lambda n: (n, 0, 0)),
                full_spec(mmask),
                full_spec(wbk), full_spec(bbk),
                full_spec(wfk), full_spec(bfk),
            ],
            out_specs=pl.BlockSpec((1, Cp, L), lambda n: (n, 0, 0)),
            scratch_shapes=[
                pltpu.VMEM((Cbp, L + 2 * M), jnp.bfloat16),   # margined bottleneck act
                pltpu.VMEM((Cp, L + 2 * M), jnp.bfloat16),    # margined pool buffer
                pltpu.VMEM((2, 5 * Cbp, L), jnp.bfloat16),    # double-buffered im2col slab
            ]),
        compiler_params=pltpu.CompilerParams(
            dimension_semantics=("parallel",),
            vmem_limit_bytes=int(vmem_limit_bytes)),
    )(xk, mmask, wbk, bbk, wfk, bfk)

    # ---- unpack back to NCHW ----
    if B > 1:
        out = out.reshape(Nb, Cp, B, HpWpL).transpose(0, 2, 1, 3).reshape(N, Cp, HpWpL)
    out = out[:, :C, :HpWp].reshape(N, C, Hp, Wp)[:, :, 2:2 + H, 2:2 + W]
    return out


def init_params(key, channels):
    Cb = channels // 2
    ks = jax.random.split(key, 8)

    def conv_params(k, out_c, in_c, ksize):
        kw, kb = jax.random.split(k)
        w = jax.random.normal(kw, (out_c, in_c, ksize, ksize), jnp.float32) * 0.2
        b = jax.random.normal(kb, (out_c,), jnp.float32) * 0.1
        return w, b

    def bn_params(k, c):
        k1, k2, k3, k4 = jax.random.split(k, 4)
        gamma = 1.0 + 0.1 * jax.random.normal(k1, (c,), jnp.float32)
        beta = 0.1 * jax.random.normal(k2, (c,), jnp.float32)
        mean = 0.1 * jax.random.normal(k3, (c,), jnp.float32)
        var = 0.5 + jax.random.uniform(k4, (c,), jnp.float32)
        return gamma, beta, mean, var

    return {
        'bottleneck': (conv_params(ks[0], Cb, channels, 1), bn_params(ks[1], Cb)),
        'conv1': (conv_params(ks[2], channels, Cb, 1), bn_params(ks[3], channels)),
        'conv3': (conv_params(ks[4], channels, Cb, 3), bn_params(ks[5], channels)),
        'conv5': (conv_params(ks[6], channels, Cb, 5), bn_params(ks[7], channels)),
    }


def reference_forward(x, params, eps=1e-5):
    def conv_bn_relu(inp, wb_tuple, bn_tuple, pad):
        w, b = wb_tuple
        gamma, beta, mean, var = bn_tuple
        y = jax.lax.conv_general_dilated(
            inp, w, window_strides=(1, 1),
            padding=((pad, pad), (pad, pad)),
            dimension_numbers=('NCHW', 'OIHW', 'NCHW'))
        y = y + b[None, :, None, None]
        y = (y - mean[None, :, None, None]) / jnp.sqrt(var[None, :, None, None] + eps)
        y = y * gamma[None, :, None, None] + beta[None, :, None, None]
        return jnp.maximum(y, 0.0)

    bn = conv_bn_relu(x, *params['bottleneck'], pad=0)
    c1 = conv_bn_relu(bn, *params['conv1'], pad=0)
    c3 = conv_bn_relu(bn, *params['conv3'], pad=1)
    c5 = conv_bn_relu(bn, *params['conv5'], pad=2)
    pool = jax.lax.reduce_window(
        x, -jnp.inf, jax.lax.max,
        window_dimensions=(1, 1, 3, 3), window_strides=(1, 1, 1, 1),
        padding=((0, 0), (0, 0), (1, 1), (1, 1)))
    return c1 + c3 + c5 + pool


if __name__ == "__main__":
    key = jax.random.PRNGKey(0)
    kx, kp = jax.random.split(key)
    N, C, H, W = 2, 4, 16, 16
    x = jax.random.normal(kx, (N, C, H, W), jnp.float32)
    params = init_params(kp, C)

    out = encoder_inception_forward(x, params)
    out = jax.block_until_ready(out)
    assert out.shape == (N, C, H, W)

    ref = reference_forward(x, params)
    # bf16 matmul operands + bf16 pooled input (f32 accumulation) vs f32 reference.
    if not jnp.allclose(out, ref, atol=6e-2, rtol=5e-2):
        max_err = jnp.max(jnp.abs(out - ref))
        raise AssertionError(f"mismatch vs reference, max abs err = {max_err}")

    print("KERNEL_OK")
</pallas_src>

<mosaic_0001>
module attributes {stable_mosaic.version = 11 : i64} {
  func.func @_inception_kernel(%arg0: i32, %arg1: memref<1x8x512xbf16, #tpu.memory_space<vmem>>, %arg2: memref<1x512xf32, #tpu.memory_space<vmem>>, %arg3: memref<8x8xbf16, #tpu.memory_space<vmem>>, %arg4: memref<8x1xf32, #tpu.memory_space<vmem>>, %arg5: memref<24x200xbf16, #tpu.memory_space<vmem>>, %arg6: memref<24x1xf32, #tpu.memory_space<vmem>>, %arg7: memref<1x8x512xf32, #tpu.memory_space<vmem>>, %arg8: memref<8x596xbf16, #tpu.memory_space<vmem>>, %arg9: memref<8x596xbf16, #tpu.memory_space<vmem>>, %arg10: memref<2x40x512xbf16, #tpu.memory_space<vmem>>) attributes {dimension_semantics = [#tpu.dimension_semantics<parallel>], iteration_bounds = array<i64: 2>, scalar_prefetch = 0 : i64, scratch_operands = 3 : i64, tpu.core_type = #tpu.core_type<tc>, window_params = [{transform_indices = @transform_0, window_bounds = array<i64: 1, 8, 512>}, {pipeline_mode = #tpu.pipeline_mode<synchronous>, transform_indices = @transform_1, window_bounds = array<i64: 1, 512>}, {pipeline_mode = #tpu.pipeline_mode<synchronous>, transform_indices = @transform_2, window_bounds = array<i64: 8, 8>}, {pipeline_mode = #tpu.pipeline_mode<synchronous>, transform_indices = @transform_3, window_bounds = array<i64: 8, 1>}, {pipeline_mode = #tpu.pipeline_mode<synchronous>, transform_indices = @transform_4, window_bounds = array<i64: 24, 200>}, {pipeline_mode = #tpu.pipeline_mode<synchronous>, transform_indices = @transform_5, window_bounds = array<i64: 24, 1>}, {transform_indices = @transform_6, window_bounds = array<i64: 1, 8, 512>}]} {
    %c0 = arith.constant 0 : index
    %c0_0 = arith.constant 0 : index
    %c0_1 = arith.constant 0 : index
    %0 = vector.load %arg1[%c0, %c0_0, %c0_1] : memref<1x8x512xbf16, #tpu.memory_space<vmem>>, vector<1x8x512xbf16>
    %1 = vector.shape_cast %0 : vector<1x8x512xbf16> to vector<8x512xbf16>
    %c0_2 = arith.constant 0 : index
    %c0_3 = arith.constant 0 : index
    %2 = vector.load %arg2[%c0_2, %c0_3] : memref<1x512xf32, #tpu.memory_space<vmem>>, vector<1x512xf32>
    %c0_4 = arith.constant 0 : index
    %c0_5 = arith.constant 0 : index
    %3 = vector.load %arg3[%c0_4, %c0_5] : memref<8x8xbf16, #tpu.memory_space<vmem>>, vector<8x8xbf16>
    %cst = arith.constant dense<0.000000e+00> : vector<8x512xf32>
    %4 = tpu.matmul %3, %1, %cst {dimension_numbers = #tpu.dot_dimension_numbers<[1], [0], [0], [1], [0, 0, 1, 1], [], []>} : vector<8x8xbf16>, vector<8x512xbf16>, vector<8x512xf32> -> vector<8x512xf32>
    %c0_6 = arith.constant 0 : index
    %c0_7 = arith.constant 0 : index
    %5 = vector.load %arg4[%c0_6, %c0_7] : memref<8x1xf32, #tpu.memory_space<vmem>>, vector<8x1xf32>
    %6 = vector.broadcast %5 : vector<8x1xf32> to vector<8x512xf32>
    %7 = arith.addf %4, %6 : vector<8x512xf32>
    %cst_8 = arith.constant 0.000000e+00 : f32
    %8 = vector.broadcast %cst_8 : f32 to vector<8x512xf32>
    %9 = arith.maximumf %7, %8 : vector<8x512xf32>
    %10 = vector.broadcast %2 : vector<1x512xf32> to vector<8x512xf32>
    %11 = arith.mulf %9, %10 : vector<8x512xf32>
    %cst_9 = arith.constant 0.000000e+00 : bf16
    %12 = vector.broadcast %cst_9 : bf16 to vector<8x42xbf16>
    %c0_10 = arith.constant 0 : index
    %c0_11 = arith.constant 0 : index
    %13 = vector.load %arg8[%c0_10, %c0_11] : memref<8x596xbf16, #tpu.memory_space<vmem>>, vector<8x42xbf16>
    tpu.vector_store %arg8[%c0_10, %c0_11], %12 {strides = array<i32>} : memref<8x596xbf16, #tpu.memory_space<vmem>>, vector<8x42xbf16>,
    %cst_12 = arith.constant 0.000000e+00 : bf16
    %14 = vector.broadcast %cst_12 : bf16 to vector<8x42xbf16>
    %c0_13 = arith.constant 0 : index
    %c554 = arith.constant 554 : index
    %15 = vector.load %arg8[%c0_13, %c554] : memref<8x596xbf16, #tpu.memory_space<vmem>>, vector<8x42xbf16>
    tpu.vector_store %arg8[%c0_13, %c554], %14 {strides = array<i32>} : memref<8x596xbf16, #tpu.memory_space<vmem>>, vector<8x42xbf16>,
    %16 = arith.truncf %11 : vector<8x512xf32> to vector<8x512xbf16>
    %c0_14 = arith.constant 0 : index
    %c42 = arith.constant 42 : index
    %17 = vector.load %arg8[%c0_14, %c42] : memref<8x596xbf16, #tpu.memory_space<vmem>>, vector<8x512xbf16>
    tpu.vector_store %arg8[%c0_14, %c42], %16 {strides = array<i32>} : memref<8x596xbf16, #tpu.memory_space<vmem>>, vector<8x512xbf16>,
    %cst_15 = arith.constant 1.000000e+00 : f32
    %18 = vector.broadcast %cst_15 : f32 to vector<1x512xf32>
    %19 = arith.subf %2, %18 : vector<1x512xf32>
    %cst_16 = arith.constant 1.000000e+30 : f32
    %20 = vector.broadcast %cst_16 : f32 to vector<1x512xf32>
    %21 = arith.mulf %19, %20 : vector<1x512xf32>
    %22 = arith.truncf %21 : vector<1x512xf32> to vector<1x512xbf16>
    %cst_17 = arith.constant -1.000260e+30 : bf16
    %23 = vector.broadcast %cst_17 : bf16 to vector<8x42xbf16>
    %c0_18 = arith.constant 0 : index
    %c0_19 = arith.constant 0 : index
    %24 = vector.load %arg9[%c0_18, %c0_19] : memref<8x596xbf16, #tpu.memory_space<vmem>>, vector<8x42xbf16>
    tpu.vector_store %arg9[%c0_18, %c0_19], %23 {strides = array<i32>} : memref<8x596xbf16, #tpu.memory_space<vmem>>, vector<8x42xbf16>,
    %cst_20 = arith.constant -1.000260e+30 : bf16
    %25 = vector.broadcast %cst_20 : bf16 to vector<8x42xbf16>
    %c0_21 = arith.constant 0 : index
    %c554_22 = arith.constant 554 : index
    %26 = vector.load %arg9[%c0_21, %c554_22] : memref<8x596xbf16, #tpu.memory_space<vmem>>, vector<8x42xbf16>
    tpu.vector_store %arg9[%c0_21, %c554_22], %25 {strides = array<i32>} : memref<8x596xbf16, #tpu.memory_space<vmem>>, vector<8x42xbf16>,
    %27 = vector.broadcast %22 : vector<1x512xbf16> to vector<8x512xbf16>
    %28 = arith.addf %1, %27 : vector<8x512xbf16>
    %c0_23 = arith.constant 0 : index
    %c42_24 = arith.constant 42 : index
    %29 = vector.load %arg9[%c0_23, %c42_24] : memref<8x596xbf16, #tpu.memory_space<vmem>>, vector<8x512xbf16>
    tpu.vector_store %arg9[%c0_23, %c42_24], %28 {strides = array<i32>} : memref<8x596xbf16, #tpu.memory_space<vmem>>, vector<8x512xbf16>,
    %c0_25 = arith.constant 0 : index
    %c0_26 = arith.constant 0 : index
    %30 = vector.load %arg6[%c0_25, %c0_26] : memref<24x1xf32, #tpu.memory_space<vmem>>, vector<24x1xf32>
    %c0_27 = arith.constant 0 : index
    %c0_28 = arith.constant 0 : index
    %31 = vector.load %arg8[%c0_27, %c0_28] : memref<8x596xbf16, #tpu.memory_space<vmem>>, vector<8x512xbf16>
    %c0_29 = arith.constant 0 : index
    %c0_30 = arith.constant 0 : index
    %c0_31 = arith.constant 0 : index
    %32 = vector.load %arg10[%c0_29, %c0_30, %c0_31] : memref<2x40x512xbf16, #tpu.memory_space<vmem>>, vector<1x8x512xbf16>
    %33 = vector.shape_cast %32 : vector<1x8x512xbf16> to vector<8x512xbf16>
    %34 = vector.shape_cast %31 : vector<8x512xbf16> to vector<1x8x512xbf16>
    tpu.vector_store %arg10[%c0_29, %c0_30, %c0_31], %34 {strides = array<i32>} : memref<2x40x512xbf16, #tpu.memory_space<vmem>>, vector<1x8x512xbf16>,
    %c0_32 = arith.constant 0 : index
    %c1 = arith.constant 1 : index
    %35 = vector.load %arg8[%c0_32, %c1] : memref<8x596xbf16, #tpu.memory_space<vmem>>, vector<8x512xbf16>
    %c0_33 = arith.constant 0 : index
    %c8 = arith.constant 8 : index
    %c0_34 = arith.constant 0 : index
    %36 = vector.load %arg10[%c0_33, %c8, %c0_34] : memref<2x40x512xbf16, #tpu.memory_space<vmem>>, vector<1x8x512xbf16>
    %37 = vector.shape_cast %36 : vector<1x8x512xbf16> to vector<8x512xbf16>
    %38 = vector.shape_cast %35 : vector<8x512xbf16> to vector<1x8x512xbf16>
    tpu.vector_store %arg10[%c0_33, %c8, %c0_34], %38 {strides = array<i32>} : memref<2x40x512xbf16, #tpu.memory_space<vmem>>, vector<1x8x512xbf16>,
    %c0_35 = arith.constant 0 : index
    %c2 = arith.constant 2 : index
    %39 = vector.load %arg8[%c0_35, %c2] : memref<8x596xbf16, #tpu.memory_space<vmem>>, vector<8x512xbf16>
    %c0_36 = arith.constant 0 : index
    %c16 = arith.constant 16 : index
    %c0_37 = arith.constant 0 : index
    %40 = vector.load %arg10[%c0_36, %c16, %c0_37] : memref<2x40x512xbf16, #tpu.memory_space<vmem>>, vector<1x8x512xbf16>
    %41 = vector.shape_cast %40 : vector<1x8x512xbf16> to vector<8x512xbf16>
    %42 = vector.shape_cast %39 : vector<8x512xbf16> to vector<1x8x512xbf16>
    tpu.vector_store %arg10[%c0_36, %c16, %c0_37], %42 {strides = array<i32>} : memref<2x40x512xbf16, #tpu.memory_space<vmem>>, vector<1x8x512xbf16>,
    %c0_38 = arith.constant 0 : index
    %c3 = arith.constant 3 : index
    %43 = vector.load %arg8[%c0_38, %c3] : memref<8x596xbf16, #tpu.memory_space<vmem>>, vector<8x512xbf16>
    %c0_39 = arith.constant 0 : index
    %c24 = arith.constant 24 : index
    %c0_40 = arith.constant 0 : index
    %44 = vector.load %arg10[%c0_39, %c24, %c0_40] : memref<2x40x512xbf16, #tpu.memory_space<vmem>>, vector<1x8x512xbf16>
    %45 = vector.shape_cast %44 : vector<1x8x512xbf16> to vector<8x512xbf16>
    %46 = vector.shape_cast %43 : vector<8x512xbf16> to vector<1x8x512xbf16>
    tpu.vector_store %arg10[%c0_39, %c24, %c0_40], %46 {strides = array<i32>} : memref<2x40x512xbf16, #tpu.memory_space<vmem>>, vector<1x8x512xbf16>,
    %c0_41 = arith.constant 0 : index
    %c4 = arith.constant 4 : index
    %47 = vector.load %arg8[%c0_41, %c4] : memref<8x596xbf16, #tpu.memory_space<vmem>>, vector<8x512xbf16>
    %c0_42 = arith.constant 0 : index
    %c32 = arith.constant 32 : index
    %c0_43 = arith.constant 0 : index
    %48 = vector.load %arg10[%c0_42, %c32, %c0_43] : memref<2x40x512xbf16, #tpu.memory_space<vmem>>, vector<1x8x512xbf16>
    %49 = vector.shape_cast %48 : vector<1x8x512xbf16> to vector<8x512xbf16>
    %50 = vector.shape_cast %47 : vector<8x512xbf16> to vector<1x8x512xbf16>
    tpu.vector_store %arg10[%c0_42, %c32, %c0_43], %50 {strides = array<i32>} : memref<2x40x512xbf16, #tpu.memory_space<vmem>>, vector<1x8x512xbf16>,
    %c0_44 = arith.constant 0 : index
    %c0_45 = arith.constant 0 : index
    %51 = vector.load %arg5[%c0_44, %c0_45] : memref<24x200xbf16, #tpu.memory_space<vmem>>, vector<24x40xbf16>
    %c0_46 = arith.constant 0 : index
    %c0_47 = arith.constant 0 : index
    %c0_48 = arith.constant 0 : index
    %52 = vector.load %arg10[%c0_46, %c0_47, %c0_48] : memref<2x40x512xbf16, #tpu.memory_space<vmem>>, vector<1x40x512xbf16>
    %53 = vector.shape_cast %52 : vector<1x40x512xbf16> to vector<40x512xbf16>
    %cst_49 = arith.constant dense<0.000000e+00> : vector<24x512xf32>
    %54 = tpu.matmul %51, %53, %cst_49 {dimension_numbers = #tpu.dot_dimension_numbers<[1], [0], [0], [1], [0, 0, 1, 1], [], []>} : vector<24x40xbf16>, vector<40x512xbf16>, vector<24x512xf32> -> vector<24x512xf32>
    %55 = vector.broadcast %30 : vector<24x1xf32> to vector<24x512xf32>
    %56 = arith.addf %55, %54 : vector<24x512xf32>
    %c0_50 = arith.constant 0 : index
    %c20 = arith.constant 20 : index
    %57 = vector.load %arg8[%c0_50, %c20] : memref<8x596xbf16, #tpu.memory_space<vmem>>, vector<8x512xbf16>
    %c1_51 = arith.constant 1 : index
    %c0_52 = arith.constant 0 : index
    %c0_53 = arith.constant 0 : index
    %58 = vector.load %arg10[%c1_51, %c0_52, %c0_53] : memref<2x40x512xbf16, #tpu.memory_space<vmem>>, vector<1x8x512xbf16>
    %59 = vector.shape_cast %58 : vector<1x8x512xbf16> to vector<8x512xbf16>
    %60 = vector.shape_cast %57 : vector<8x512xbf16> to vector<1x8x512xbf16>
    tpu.vector_store %arg10[%c1_51, %c0_52, %c0_53], %60 {strides = array<i32>} : memref<2x40x512xbf16, #tpu.memory_space<vmem>>, vector<1x8x512xbf16>,
    %c0_54 = arith.constant 0 : index
    %c21 = arith.constant 21 : index
    %61 = vector.load %arg8[%c0_54, %c21] : memref<8x596xbf16, #tpu.memory_space<vmem>>, vector<8x512xbf16>
    %c1_55 = arith.constant 1 : index
    %c8_56 = arith.constant 8 : index
    %c0_57 = arith.constant 0 : index
    %62 = vector.load %arg10[%c1_55, %c8_56, %c0_57] : memref<2x40x512xbf16, #tpu.memory_space<vmem>>, vector<1x8x512xbf16>
    %63 = vector.shape_cast %62 : vector<1x8x512xbf16> to vector<8x512xbf16>
    %64 = vector.shape_cast %61 : vector<8x512xbf16> to vector<1x8x512xbf16>
    tpu.vector_store %arg10[%c1_55, %c8_56, %c0_57], %64 {strides = array<i32>} : memref<2x40x512xbf16, #tpu.memory_space<vmem>>, vector<1x8x512xbf16>,
    %c0_58 = arith.constant 0 : index
    %c22 = arith.constant 22 : index
    %65 = vector.load %arg8[%c0_58, %c22] : memref<8x596xbf16, #tpu.memory_space<vmem>>, vector<8x512xbf16>
    %c1_59 = arith.constant 1 : index
    %c16_60 = arith.constant 16 : index
    %c0_61 = arith.constant 0 : index
    %66 = vector.load %arg10[%c1_59, %c16_60, %c0_61] : memref<2x40x512xbf16, #tpu.memory_space<vmem>>, vector<1x8x512xbf16>
    %67 = vector.shape_cast %66 : vector<1x8x512xbf16> to vector<8x512xbf16>
    %68 = vector.shape_cast %65 : vector<8x512xbf16> to vector<1x8x512xbf16>
    tpu.vector_store %arg10[%c1_59, %c16_60, %c0_61], %68 {strides = array<i32>} : memref<2x40x512xbf16, #tpu.memory_space<vmem>>, vector<1x8x512xbf16>,
    %c0_62 = arith.constant 0 : index
    %c23 = arith.constant 23 : index
    %69 = vector.load %arg8[%c0_62, %c23] : memref<8x596xbf16, #tpu.memory_space<vmem>>, vector<8x512xbf16>
    %c1_63 = arith.constant 1 : index
    %c24_64 = arith.constant 24 : index
    %c0_65 = arith.constant 0 : index
    %70 = vector.load %arg10[%c1_63, %c24_64, %c0_65] : memref<2x40x512xbf16, #tpu.memory_space<vmem>>, vector<1x8x512xbf16>
    %71 = vector.shape_cast %70 : vector<1x8x512xbf16> to vector<8x512xbf16>
    %72 = vector.shape_cast %69 : vector<8x512xbf16> to vector<1x8x512xbf16>
    tpu.vector_store %arg10[%c1_63, %c24_64, %c0_65], %72 {strides = array<i32>} : memref<2x40x512xbf16, #tpu.memory_space<vmem>>, vector<1x8x512xbf16>,
    %c0_66 = arith.constant 0 : index
    %c24_67 = arith.constant 24 : index
    %73 = vector.load %arg8[%c0_66, %c24_67] : memref<8x596xbf16, #tpu.memory_space<vmem>>, vector<8x512xbf16>
    %c1_68 = arith.constant 1 : index
    %c32_69 = arith.constant 32 : index
    %c0_70 = arith.constant 0 : index
    %74 = vector.load %arg10[%c1_68, %c32_69, %c0_70] : memref<2x40x512xbf16, #tpu.memory_space<vmem>>, vector<1x8x512xbf16>
    %75 = vector.shape_cast %74 : vector<1x8x512xbf16> to vector<8x512xbf16>
    %76 = vector.shape_cast %73 : vector<8x512xbf16> to vector<1x8x512xbf16>
    tpu.vector_store %arg10[%c1_68, %c32_69, %c0_70], %76 {strides = array<i32>} : memref<2x40x512xbf16, #tpu.memory_space<vmem>>, vector<1x8x512xbf16>,
    %c0_71 = arith.constant 0 : index
    %c40 = arith.constant 40 : index
    %77 = vector.load %arg5[%c0_71, %c40] : memref<24x200xbf16, #tpu.memory_space<vmem>>, vector<24x40xbf16>
    %c1_72 = arith.constant 1 : index
    %c0_73 = arith.constant 0 : index
    %c0_74 = arith.constant 0 : index
    %78 = vector.load %arg10[%c1_72, %c0_73, %c0_74] : memref<2x40x512xbf16, #tpu.memory_space<vmem>>, vector<1x40x512xbf16>
    %79 = vector.shape_cast %78 : vector<1x40x512xbf16> to vector<40x512xbf16>
    %cst_75 = arith.constant dense<0.000000e+00> : vector<24x512xf32>
    %80 = tpu.matmul %77, %79, %cst_75 {dimension_numbers = #tpu.dot_dimension_numbers<[1], [0], [0], [1], [0, 0, 1, 1], [], []>} : vector<24x40xbf16>, vector<40x512xbf16>, vector<24x512xf32> -> vector<24x512xf32>
    %81 = arith.addf %56, %80 : vector<24x512xf32>
    %c0_76 = arith.constant 0 : index
    %c40_77 = arith.constant 40 : index
    %82 = vector.load %arg8[%c0_76, %c40_77] : memref<8x596xbf16, #tpu.memory_space<vmem>>, vector<8x512xbf16>
    %c0_78 = arith.constant 0 : index
    %c0_79 = arith.constant 0 : index
    %c0_80 = arith.constant 0 : index
    %83 = vector.load %arg10[%c0_78, %c0_79, %c0_80] : memref<2x40x512xbf16, #tpu.memory_space<vmem>>, vector<1x8x512xbf16>
    %84 = vector.shape_cast %83 : vector<1x8x512xbf16> to vector<8x512xbf16>
    %85 = vector.shape_cast %82 : vector<8x512xbf16> to vector<1x8x512xbf16>
    tpu.vector_store %arg10[%c0_78, %c0_79, %c0_80], %85 {strides = array<i32>} : memref<2x40x512xbf16, #tpu.memory_space<vmem>>, vector<1x8x512xbf16>,
    %c0_81 = arith.constant 0 : index
    %c41 = arith.constant 41 : index
    %86 = vector.load %arg8[%c0_81, %c41] : memref<8x596xbf16, #tpu.memory_space<vmem>>, vector<8x512xbf16>
    %c0_82 = arith.constant 0 : index
    %c8_83 = arith.constant 8 : index
    %c0_84 = arith.constant 0 : index
    %87 = vector.load %arg10[%c0_82, %c8_83, %c0_84] : memref<2x40x512xbf16, #tpu.memory_space<vmem>>, vector<1x8x512xbf16>
    %88 = vector.shape_cast %87 : vector<1x8x512xbf16> to vector<8x512xbf16>
    %89 = vector.shape_cast %86 : vector<8x512xbf16> to vector<1x8x512xbf16>
    tpu.vector_store %arg10[%c0_82, %c8_83, %c0_84], %89 {strides = array<i32>} : memref<2x40x512xbf16, #tpu.memory_space<vmem>>, vector<1x8x512xbf16>,
    %c0_85 = arith.constant 0 : index
    %c42_86 = arith.constant 42 : index
    %90 = vector.load %arg8[%c0_85, %c42_86] : memref<8x596xbf16, #tpu.memory_space<vmem>>, vector<8x512xbf16>
    %c0_87 = arith.constant 0 : index
    %c16_88 = arith.constant 16 : index
    %c0_89 = arith.constant 0 : index
    %91 = vector.load %arg10[%c0_87, %c16_88, %c0_89] : memref<2x40x512xbf16, #tpu.memory_space<vmem>>, vector<1x8x512xbf16>
    %92 = vector.shape_cast %91 : vector<1x8x512xbf16> to vector<8x512xbf16>
    %93 = vector.shape_cast %90 : vector<8x512xbf16> to vector<1x8x512xbf16>
    tpu.vector_store %arg10[%c0_87, %c16_88, %c0_89], %93 {strides = array<i32>} : memref<2x40x512xbf16, #tpu.memory_space<vmem>>, vector<1x8x512xbf16>,
    %c0_90 = arith.constant 0 : index
    %c43 = arith.constant 43 : index
    %94 = vector.load %arg8[%c0_90, %c43] : memref<8x596xbf16, #tpu.memory_space<vmem>>, vector<8x512xbf16>
    %c0_91 = arith.constant 0 : index
    %c24_92 = arith.constant 24 : index
    %c0_93 = arith.constant 0 : index
    %95 = vector.load %arg10[%c0_91, %c24_92, %c0_93] : memref<2x40x512xbf16, #tpu.memory_space<vmem>>, vector<1x8x512xbf16>
    %96 = vector.shape_cast %95 : vector<1x8x512xbf16> to vector<8x512xbf16>
    %97 = vector.shape_cast %94 : vector<8x512xbf16> to vector<1x8x512xbf16>
    tpu.vector_store %arg10[%c0_91, %c24_92, %c0_93], %97 {strides = array<i32>} : memref<2x40x512xbf16, #tpu.memory_space<vmem>>, vector<1x8x512xbf16>,
    %c0_94 = arith.constant 0 : index
    %c44 = arith.constant 44 : index
    %98 = vector.load %arg8[%c0_94, %c44] : memref<8x596xbf16, #tpu.memory_space<vmem>>, vector<8x512xbf16>
    %c0_95 = arith.constant 0 : index
    %c32_96 = arith.constant 32 : index
    %c0_97 = arith.constant 0 : index
    %99 = vector.load %arg10[%c0_95, %c32_96, %c0_97] : memref<2x40x512xbf16, #tpu.memory_space<vmem>>, vector<1x8x512xbf16>
    %100 = vector.shape_cast %99 : vector<1x8x512xbf16> to vector<8x512xbf16>
    %101 = vector.shape_cast %98 : vector<8x512xbf16> to vector<1x8x512xbf16>
    tpu.vector_store %arg10[%c0_95, %c32_96, %c0_97], %101 {strides = array<i32>} : memref<2x40x512xbf16, #tpu.memory_space<vmem>>, vector<1x8x512xbf16>,
    %c0_98 = arith.constant 0 : index
    %c80 = arith.constant 80 : index
    %102 = vector.load %arg5[%c0_98, %c80] : memref<24x200xbf16, #tpu.memory_space<vmem>>, vector<24x40xbf16>
    %c0_99 = arith.constant 0 : index
    %c0_100 = arith.constant 0 : index
    %c0_101 = arith.constant 0 : index
    %103 = vector.load %arg10[%c0_99, %c0_100, %c0_101] : memref<2x40x512xbf16, #tpu.memory_space<vmem>>, vector<1x40x512xbf16>
    %104 = vector.shape_cast %103 : vector<1x40x512xbf16> to vector<40x512xbf16>
    %cst_102 = arith.constant dense<0.000000e+00> : vector<24x512xf32>
    %105 = tpu.matmul %102, %104, %cst_102 {dimension_numbers = #tpu.dot_dimension_numbers<[1], [0], [0], [1], [0, 0, 1, 1], [], []>} : vector<24x40xbf16>, vector<40x512xbf16>, vector<24x512xf32> -> vector<24x512xf32>
    %106 = arith.addf %81, %105 : vector<24x512xf32>
    %c0_103 = arith.constant 0 : index
    %c60 = arith.constant 60 : index
    %107 = vector.load %arg8[%c0_103, %c60] : memref<8x596xbf16, #tpu.memory_space<vmem>>, vector<8x512xbf16>
    %c1_104 = arith.constant 1 : index
    %c0_105 = arith.constant 0 : index
    %c0_106 = arith.constant 0 : index
    %108 = vector.load %arg10[%c1_104, %c0_105, %c0_106] : memref<2x40x512xbf16, #tpu.memory_space<vmem>>, vector<1x8x512xbf16>
    %109 = vector.shape_cast %108 : vector<1x8x512xbf16> to vector<8x512xbf16>
    %110 = vector.shape_cast %107 : vector<8x512xbf16> to vector<1x8x512xbf16>
    tpu.vector_store %arg10[%c1_104, %c0_105, %c0_106], %110 {strides = array<i32>} : memref<2x40x512xbf16, #tpu.memory_space<vmem>>, vector<1x8x512xbf16>,
    %c0_107 = arith.constant 0 : index
    %c61 = arith.constant 61 : index
    %111 = vector.load %arg8[%c0_107, %c61] : memref<8x596xbf16, #tpu.memory_space<vmem>>, vector<8x512xbf16>
    %c1_108 = arith.constant 1 : index
    %c8_109 = arith.constant 8 : index
    %c0_110 = arith.constant 0 : index
    %112 = vector.load %arg10[%c1_108, %c8_109, %c0_110] : memref<2x40x512xbf16, #tpu.memory_space<vmem>>, vector<1x8x512xbf16>
    %113 = vector.shape_cast %112 : vector<1x8x512xbf16> to vector<8x512xbf16>
    %114 = vector.shape_cast %111 : vector<8x512xbf16> to vector<1x8x512xbf16>
    tpu.vector_store %arg10[%c1_108, %c8_109, %c0_110], %114 {strides = array<i32>} : memref<2x40x512xbf16, #tpu.memory_space<vmem>>, vector<1x8x512xbf16>,
    %c0_111 = arith.constant 0 : index
    %c62 = arith.constant 62 : index
    %115 = vector.load %arg8[%c0_111, %c62] : memref<8x596xbf16, #tpu.memory_space<vmem>>, vector<8x512xbf16>
    %c1_112 = arith.constant 1 : index
    %c16_113 = arith.constant 16 : index
    %c0_114 = arith.constant 0 : index
    %116 = vector.load %arg10[%c1_112, %c16_113, %c0_114] : memref<2x40x512xbf16, #tpu.memory_space<vmem>>, vector<1x8x512xbf16>
    %117 = vector.shape_cast %116 : vector<1x8x512xbf16> to vector<8x512xbf16>
    %118 = vector.shape_cast %115 : vector<8x512xbf16> to vector<1x8x512xbf16>
    tpu.vector_store %arg10[%c1_112, %c16_113, %c0_114], %118 {strides = array<i32>} : memref<2x40x512xbf16, #tpu.memory_space<vmem>>, vector<1x8x512xbf16>,
    %c0_115 = arith.constant 0 : index
    %c63 = arith.constant 63 : index
    %119 = vector.load %arg8[%c0_115, %c63] : memref<8x596xbf16, #tpu.memory_space<vmem>>, vector<8x512xbf16>
    %c1_116 = arith.constant 1 : index
    %c24_117 = arith.constant 24 : index
    %c0_118 = arith.constant 0 : index
    %120 = vector.load %arg10[%c1_116, %c24_117, %c0_118] : memref<2x40x512xbf16, #tpu.memory_space<vmem>>, vector<1x8x512xbf16>
    %121 = vector.shape_cast %120 : vector<1x8x512xbf16> to vector<8x512xbf16>
    %122 = vector.shape_cast %119 : vector<8x512xbf16> to vector<1x8x512xbf16>
    tpu.vector_store %arg10[%c1_116, %c24_117, %c0_118], %122 {strides = array<i32>} : memref<2x40x512xbf16, #tpu.memory_space<vmem>>, vector<1x8x512xbf16>,
    %c0_119 = arith.constant 0 : index
    %c64 = arith.constant 64 : index
    %123 = vector.load %arg8[%c0_119, %c64] : memref<8x596xbf16, #tpu.memory_space<vmem>>, vector<8x512xbf16>
    %c1_120 = arith.constant 1 : index
    %c32_121 = arith.constant 32 : index
    %c0_122 = arith.constant 0 : index
    %124 = vector.load %arg10[%c1_120, %c32_121, %c0_122] : memref<2x40x512xbf16, #tpu.memory_space<vmem>>, vector<1x8x512xbf16>
    %125 = vector.shape_cast %124 : vector<1x8x512xbf16> to vector<8x512xbf16>
    %126 = vector.shape_cast %123 : vector<8x512xbf16> to vector<1x8x512xbf16>
    tpu.vector_store %arg10[%c1_120, %c32_121, %c0_122], %126 {strides = array<i32>} : memref<2x40x512xbf16, #tpu.memory_space<vmem>>, vector<1x8x512xbf16>,
    %c0_123 = arith.constant 0 : index
    %c120 = arith.constant 120 : index
    %127 = vector.load %arg5[%c0_123, %c120] : memref<24x200xbf16, #tpu.memory_space<vmem>>, vector<24x40xbf16>
    %c1_124 = arith.constant 1 : index
    %c0_125 = arith.constant 0 : index
    %c0_126 = arith.constant 0 : index
    %128 = vector.load %arg10[%c1_124, %c0_125, %c0_126] : memref<2x40x512xbf16, #tpu.memory_space<vmem>>, vector<1x40x512xbf16>
    %129 = vector.shape_cast %128 : vector<1x40x512xbf16> to vector<40x512xbf16>
    %cst_127 = arith.constant dense<0.000000e+00> : vector<24x512xf32>
    %130 = tpu.matmul %127, %129, %cst_127 {dimension_numbers = #tpu.dot_dimension_numbers<[1], [0], [0], [1], [0, 0, 1, 1], [], []>} : vector<24x40xbf16>, vector<40x512xbf16>, vector<24x512xf32> -> vector<24x512xf32>
    %131 = arith.addf %106, %130 : vector<24x512xf32>
    %c0_128 = arith.constant 0 : index
    %c80_129 = arith.constant 80 : index
    %132 = vector.load %arg8[%c0_128, %c80_129] : memref<8x596xbf16, #tpu.memory_space<vmem>>, vector<8x512xbf16>
    %c0_130 = arith.constant 0 : index
    %c0_131 = arith.constant 0 : index
    %c0_132 = arith.constant 0 : index
    %133 = vector.load %arg10[%c0_130, %c0_131, %c0_132] : memref<2x40x512xbf16, #tpu.memory_space<vmem>>, vector<1x8x512xbf16>
    %134 = vector.shape_cast %133 : vector<1x8x512xbf16> to vector<8x512xbf16>
    %135 = vector.shape_cast %132 : vector<8x512xbf16> to vector<1x8x512xbf16>
    tpu.vector_store %arg10[%c0_130, %c0_131, %c0_132], %135 {strides = array<i32>} : memref<2x40x512xbf16, #tpu.memory_space<vmem>>, vector<1x8x512xbf16>,
    %c0_133 = arith.constant 0 : index
    %c81 = arith.constant 81 : index
    %136 = vector.load %arg8[%c0_133, %c81] : memref<8x596xbf16, #tpu.memory_space<vmem>>, vector<8x512xbf16>
    %c0_134 = arith.constant 0 : index
    %c8_135 = arith.constant 8 : index
    %c0_136 = arith.constant 0 : index
    %137 = vector.load %arg10[%c0_134, %c8_135, %c0_136] : memref<2x40x512xbf16, #tpu.memory_space<vmem>>, vector<1x8x512xbf16>
    %138 = vector.shape_cast %137 : vector<1x8x512xbf16> to vector<8x512xbf16>
    %139 = vector.shape_cast %136 : vector<8x512xbf16> to vector<1x8x512xbf16>
    tpu.vector_store %arg10[%c0_134, %c8_135, %c0_136], %139 {strides = array<i32>} : memref<2x40x512xbf16, #tpu.memory_space<vmem>>, vector<1x8x512xbf16>,
    %c0_137 = arith.constant 0 : index
    %c82 = arith.constant 82 : index
    %140 = vector.load %arg8[%c0_137, %c82] : memref<8x596xbf16, #tpu.memory_space<vmem>>, vector<8x512xbf16>
    %c0_138 = arith.constant 0 : index
    %c16_139 = arith.constant 16 : index
    %c0_140 = arith.constant 0 : index
    %141 = vector.load %arg10[%c0_138, %c16_139, %c0_140] : memref<2x40x512xbf16, #tpu.memory_space<vmem>>, vector<1x8x512xbf16>
    %142 = vector.shape_cast %141 : vector<1x8x512xbf16> to vector<8x512xbf16>
    %143 = vector.shape_cast %140 : vector<8x512xbf16> to vector<1x8x512xbf16>
    tpu.vector_store %arg10[%c0_138, %c16_139, %c0_140], %143 {strides = array<i32>} : memref<2x40x512xbf16, #tpu.memory_space<vmem>>, vector<1x8x512xbf16>,
    %c0_141 = arith.constant 0 : index
    %c83 = arith.constant 83 : index
    %144 = vector.load %arg8[%c0_141, %c83] : memref<8x596xbf16, #tpu.memory_space<vmem>>, vector<8x512xbf16>
    %c0_142 = arith.constant 0 : index
    %c24_143 = arith.constant 24 : index
    %c0_144 = arith.constant 0 : index
    %145 = vector.load %arg10[%c0_142, %c24_143, %c0_144] : memref<2x40x512xbf16, #tpu.memory_space<vmem>>, vector<1x8x512xbf16>
    %146 = vector.shape_cast %145 : vector<1x8x512xbf16> to vector<8x512xbf16>
    %147 = vector.shape_cast %144 : vector<8x512xbf16> to vector<1x8x512xbf16>
    tpu.vector_store %arg10[%c0_142, %c24_143, %c0_144], %147 {strides = array<i32>} : memref<2x40x512xbf16, #tpu.memory_space<vmem>>, vector<1x8x512xbf16>,
    %c0_145 = arith.constant 0 : index
    %c84 = arith.constant 84 : index
    %148 = vector.load %arg8[%c0_145, %c84] : memref<8x596xbf16, #tpu.memory_space<vmem>>, vector<8x512xbf16>
    %c0_146 = arith.constant 0 : index
    %c32_147 = arith.constant 32 : index
    %c0_148 = arith.constant 0 : index
    %149 = vector.load %arg10[%c0_146, %c32_147, %c0_148] : memref<2x40x512xbf16, #tpu.memory_space<vmem>>, vector<1x8x512xbf16>
    %150 = vector.shape_cast %149 : vector<1x8x512xbf16> to vector<8x512xbf16>
    %151 = vector.shape_cast %148 : vector<8x512xbf16> to vector<1x8x512xbf16>
    tpu.vector_store %arg10[%c0_146, %c32_147, %c0_148], %151 {strides = array<i32>} : memref<2x40x512xbf16, #tpu.memory_space<vmem>>, vector<1x8x512xbf16>,
    %c0_149 = arith.constant 0 : index
    %c160 = arith.constant 160 : index
    %152 = vector.load %arg5[%c0_149, %c160] : memref<24x200xbf16, #tpu.memory_space<vmem>>, vector<24x40xbf16>
    %c0_150 = arith.constant 0 : index
    %c0_151 = arith.constant 0 : index
    %c0_152 = arith.constant 0 : index
    %153 = vector.load %arg10[%c0_150, %c0_151, %c0_152] : memref<2x40x512xbf16, #tpu.memory_space<vmem>>, vector<1x40x512xbf16>
    %154 = vector.shape_cast %153 : vector<1x40x512xbf16> to vector<40x512xbf16>
    %cst_153 = arith.constant dense<0.000000e+00> : vector<24x512xf32>
    %155 = tpu.matmul %152, %154, %cst_153 {dimension_numbers = #tpu.dot_dimension_numbers<[1], [0], [0], [1], [0, 0, 1, 1], [], []>} : vector<24x40xbf16>, vector<40x512xbf16>, vector<24x512xf32> -> vector<24x512xf32>
    %156 = arith.addf %131, %155 : vector<24x512xf32>
    %157 = vector.extract_strided_slice %156 {offsets = [0, 0], sizes = [8, 512], strides = [1, 1]} : vector<24x512xf32> to vector<8x512xf32>
    %cst_154 = arith.constant 0.000000e+00 : f32
    %158 = vector.broadcast %cst_154 : f32 to vector<8x512xf32>
    %159 = arith.maximumf %157, %158 : vector<8x512xf32>
    %160 = vector.extract_strided_slice %156 {offsets = [8, 0], sizes = [8, 512], strides = [1, 1]} : vector<24x512xf32> to vector<8x512xf32>
    %cst_155 = arith.constant 0.000000e+00 : f32
    %161 = vector.broadcast %cst_155 : f32 to vector<8x512xf32>
    %162 = arith.maximumf %160, %161 : vector<8x512xf32>
    %163 = arith.addf %159, %162 : vector<8x512xf32>
    %164 = vector.extract_strided_slice %156 {offsets = [16, 0], sizes = [8, 512], strides = [1, 1]} : vector<24x512xf32> to vector<8x512xf32>
    %cst_156 = arith.constant 0.000000e+00 : f32
    %165 = vector.broadcast %cst_156 : f32 to vector<8x512xf32>
    %166 = arith.maximumf %164, %165 : vector<8x512xf32>
    %167 = arith.addf %163, %166 : vector<8x512xf32>
    %c0_157 = arith.constant 0 : index
    %c41_158 = arith.constant 41 : index
    %168 = vector.load %arg9[%c0_157, %c41_158] : memref<8x596xbf16, #tpu.memory_space<vmem>>, vector<8x512xbf16>
    %c0_159 = arith.constant 0 : index
    %c42_160 = arith.constant 42 : index
    %169 = vector.load %arg9[%c0_159, %c42_160] : memref<8x596xbf16, #tpu.memory_space<vmem>>, vector<8x512xbf16>
    %170 = arith.maximumf %168, %169 : vector<8x512xbf16>
    %c0_161 = arith.constant 0 : index
    %c43_162 = arith.constant 43 : index
    %171 = vector.load %arg9[%c0_161, %c43_162] : memref<8x596xbf16, #tpu.memory_space<vmem>>, vector<8x512xbf16>
    %172 = arith.maximumf %170, %171 : vector<8x512xbf16>
    %c0_163 = arith.constant 0 : index
    %c42_164 = arith.constant 42 : index
    %173 = vector.load %arg9[%c0_163, %c42_164] : memref<8x596xbf16, #tpu.memory_space<vmem>>, vector<8x512xbf16>
    tpu.vector_store %arg9[%c0_163, %c42_164], %172 {strides = array<i32>} : memref<8x596xbf16, #tpu.memory_space<vmem>>, vector<8x512xbf16>,
    %c0_165 = arith.constant 0 : index
    %c22_166 = arith.constant 22 : index
    %174 = vector.load %arg9[%c0_165, %c22_166] : memref<8x596xbf16, #tpu.memory_space<vmem>>, vector<8x512xbf16>
    %175 = arith.maximumf %174, %172 : vector<8x512xbf16>
    %c0_167 = arith.constant 0 : index
    %c62_168 = arith.constant 62 : index
    %176 = vector.load %arg9[%c0_167, %c62_168] : memref<8x596xbf16, #tpu.memory_space<vmem>>, vector<8x512xbf16>
    %177 = arith.maximumf %175, %176 : vector<8x512xbf16>
    %178 = arith.extf %177 : vector<8x512xbf16> to vector<8x512xf32>
    %179 = arith.addf %167, %178 : vector<8x512xf32>
    %c0_169 = arith.constant 0 : index
    %c0_170 = arith.constant 0 : index
    %c0_171 = arith.constant 0 : index
    %180 = vector.load %arg7[%c0_169, %c0_170, %c0_171] : memref<1x8x512xf32, #tpu.memory_space<vmem>>, vector<1x8x512xf32>
    %181 = vector.shape_cast %180 : vector<1x8x512xf32> to vector<8x512xf32>
    %182 = vector.shape_cast %179 : vector<8x512xf32> to vector<1x8x512xf32>
    tpu.vector_store %arg7[%c0_169, %c0_170, %c0_171], %182 {strides = array<i32>} : memref<1x8x512xf32, #tpu.memory_space<vmem>>, vector<1x8x512xf32>,
    return
  }
  func.func @transform_0(%arg0: i32) -> (i32, i32, i32) {
    %c0_i32 = arith.constant 0 : i32
    %c0_i32_0 = arith.constant 0 : i32
    %c0_i32_1 = arith.constant 0 : i32
    return %arg0, %c0_i32, %c0_i32_0 : i32, i32, i32
  }
  func.func @transform_1(%arg0: i32) -> (i32, i32) {
    %c0_i32 = arith.constant 0 : i32
    %c0_i32_0 = arith.constant 0 : i32
    %c0_i32_1 = arith.constant 0 : i32
    return %c0_i32, %c0_i32_0 : i32, i32
  }
  func.func @transform_2(%arg0: i32) -> (i32, i32) {
    %c0_i32 = arith.constant 0 : i32
    %c0_i32_0 = arith.constant 0 : i32
    %c0_i32_1 = arith.constant 0 : i32
    return %c0_i32, %c0_i32_0 : i32, i32
  }
  func.func @transform_3(%arg0: i32) -> (i32, i32) {
    %c0_i32 = arith.constant 0 : i32
    %c0_i32_0 = arith.constant 0 : i32
    %c0_i32_1 = arith.constant 0 : i32
    return %c0_i32, %c0_i32_0 : i32, i32
  }
  func.func @transform_4(%arg0: i32) -> (i32, i32) {
    %c0_i32 = arith.constant 0 : i32
    %c0_i32_0 = arith.constant 0 : i32
    %c0_i32_1 = arith.constant 0 : i32
    return %c0_i32, %c0_i32_0 : i32, i32
  }
  func.func @transform_5(%arg0: i32) -> (i32, i32) {
    %c0_i32 = arith.constant 0 : i32
    %c0_i32_0 = arith.constant 0 : i32
    %c0_i32_1 = arith.constant 0 : i32
    return %c0_i32, %c0_i32_0 : i32, i32
  }
  func.func @transform_6(%arg0: i32) -> (i32, i32, i32) {
    %c0_i32 = arith.constant 0 : i32
    %c0_i32_0 = arith.constant 0 : i32
    %c0_i32_1 = arith.constant 0 : i32
    return %arg0, %c0_i32, %c0_i32_0 : i32, i32, i32
  }
}

</mosaic_0001>

<bundles_post_ra>
// kernel: tpu_custom_call.1
= control target key start
LH: loop header
LB: loop body
LE: loop exit
PB: predicated region body
PF: predicated region fallthrough
CT: control target
= control target key end

     0   :  { %11 = vsyncpa [#allocation6], 0  ;;  %s3842_s0 = inlined_call_operand.vmem [shape: bf16[2,8,512], index: 0, kind: input, shape index: {}]   ;;  %s3843_s1 = inlined_call_operand.hbm [shape: f32[1,512], index: 1, kind: input, shape index: {}]   ;;  %s3844_s2 = inlined_call_operand.vmem [shape: bf16[8,8], index: 2, kind: input, shape index: {}]   ;;  %s3845_s3 = inlined_call_operand.vmem [shape: f32[8,1], index: 3, kind: input, shape index: {}]   ;;  %s3846_s4 = inlined_call_operand.hbm [shape: bf16[24,200], index: 4, kind: input, shape index: {}]   ;;  %s3847_s5 = inlined_call_operand.vmem [shape: f32[24,1], index: 5, kind: input, shape index: {}]   ;;  %s3848_s6 = inlined_call_operand.hbm [shape: f32[2,8,512], index: 6, kind: output, shape index: {}]  }
   0x1   :  { %12 = vsyncpa [#allocation9], 0 }
   0x2   :  { %13 = vsyncpa [#allocation7], 0 }
   0x3   :  { %15 = vsyncpa [#allocation7 + $0x1], 0  ;;  %s2911_s21 = smov 0   ;;  %s2913_s22 = smov 0  }
   0x4   :  { %s2915_s23 = smov 0   ;;  %s2917_s24 = smov 0  }
   0x5 LB: > { %s2932_s25 = sadd.s32 4294967295, %s2838_s24   ;;  %s2461_s26 = sadd.s32 4294967294, %s2838_s24   ;;  %s2838_s24 = sphi %s2917_s24, %s3949_s24   ;;  %s2834_s23 = sphi %s2915_s23, %s3948_s23   ;;  %s2830_s22 = sphi %s2913_s22, %s3947_s22   ;;  %s2826_s21 = sphi %s2911_s21, %s3946_s21  }
   0x6   : > { %s2936_s27 = sadd.s32 1, %s2838_s24   ;;  %s159_s28 = sadd.s32 1, %s2834_s23 }
   0x7   : > { %s156_s29 = ssub.s32 %s2838_s24, %s2936_s27  ;;  %p169_p0 = scmp.ne.s32.totalorder %s2834_s23, %s2830_s22 }
   0x8   : > { %p157_p1 = scmp.eq.s32.totalorder %s156_s29, 0  ;;  %p170_p2 = scmp.eq.s32.totalorder %s2932_s25, 1 }
   0x9   : > { %p175_p3 = scmp.ne.s32.totalorder %s2830_s22, %s2826_s21  ;;  %p176_p4 = scmp.eq.s32.totalorder %s2461_s26, 1 }
   0xa   : > { %s2947_s30 = scalar_select %p157_p1, %s2834_s23, %s159_s28  }
   0xb   : > { %p2949_p5 = por %p170_p2, %p169_p0  ;;  %p2953_p6 = por %p176_p4, %p175_p3 }
   0xc   : > { %p2462_p7 = scmp.ge.s32.totalorder %s2838_s24, 1  ;;  %p183_p8 = scmp.lt.s32.totalorder %s2838_s24, 3 }
   0xd   : > { %s3876_s7 = scalar_select %p2949_p5, 1, 0 }
   0xe   : > { %s3877_s8 = scalar_select %p2953_p6, 1, 0 }
   0xf   : > { %p3849_p9 = scmp.eq.s32.totalorder %s2932_s25, 0  ;;  %p2960_p10 = pnand %p2462_p7, %p183_p8 }
  0x10   : > { %s2840_s10 = smov [#allocation5]   ;;  %s2841_s12 = smov [#allocation8]  }
  0x11   : > { %s3878_s9 = scalar_select %p2960_p10, 1, 0 }
  0x12   : > { %s196_s11 = sshll.u32 %s2840_s10, 4  ;;  %p2606_p11 = pneg %p2960_p10  ;;  %s197_s11 = int_to_ptr.vmem [resolvable:$true] %s196_s11 }
  0x13   : > { %s212_s13 = sshll.u32 %s2841_s12, 4  ;;  %s2729_s15 = scalar_lea.vmem %s197_s11, 64  ;;  %s213_s13 = int_to_ptr.vmem [resolvable:$true] %s212_s13 }
  0x14   : > { %p2968_p12 = pnand %p3849_p9, %p2606_p11  ;;  %p2730_p0 = scmp.ne.s32.totalorder %s197_s11, %s2729_s15 }
  0x15   : > { %p2737_p3 = scmp.lt.s32.totalorder %s197_s11, %s197_s11  ;;  %p2738_p4 = scmp.lt.s32.totalorder %s2729_s15, %s2729_s15 }
  0x16   : > { %p2720_p13 = pneg %p2968_p12 }
  0x17   : > { %p2739_p7 = por %p2738_p4, %p2737_p3 }
  0x18   : > { %p2732_p1 = pnand %p2730_p0, %p2720_p13 }
  0x1a   : > { %p2733_p2 = pneg %p2732_p1 }
  0x1c   : > { %p2740_p8 = pnand %p2739_p7, %p2733_p2 }
  0x1e   : > { %2743 = shalt.err (!%p2740_p8)
}
  0x1f   : > { %2609 = dma.hbm_to_vmem [thread:$0]  (!%p2968_p12), %s3843_s1, 64, %s197_s11, [#allocation6]  }
  0x20   : > { %s2755_s18 = scalar_lea.vmem %s213_s13, 384  ;;  %p2763_p0 = scmp.lt.s32.totalorder %s213_s13, %s213_s13 }
  0x21   : > { %p2756_p11 = scmp.ne.s32.totalorder %s213_s13, %s2755_s18  ;;  %p2764_p1 = scmp.lt.s32.totalorder %s2755_s18, %s2755_s18 }
  0x23   : > { %p2758_p9 = pnand %p2756_p11, %p2720_p13  ;;  %p2765_p5 = por %p2764_p1, %p2763_p0 }
  0x25   : > { %p2759_p6 = pneg %p2758_p9 }
  0x27   : > { %p2766_p10 = pnand %p2765_p5, %p2759_p6 }
  0x29   : > { %2769 = shalt.err (!%p2766_p10)
}
  0x2a   : > { %s2842_s19 = smov 128   ;;  %s2843_s20 = smov 8  }
  0x2b   : > { %2612 = dma.hbm_to_vmem [thread:$0]  (!%p2968_p12), %s3846_s4, 384, %s213_s13, [#allocation9], %s2842_s19, %s2842_s19, %s2843_s20  }
  0x2c   : > { %p3880_p2 = scmp.ne.s32.totalorder %s3878_s9, 0 }
  0x2e   : > { %239 = sbr.rel (%p3880_p2) target bundleno = 1076 (0x434), region = 44 }
  0x33   : > { %p3881_p3 = scmp.eq.s32.totalorder %s2932_s25, 0 }
  0x35   : > { %2813 = dma.done.wait (%p3881_p3), [#allocation6], 64   ;;  %p3882_p9 = pmov %p3881_p3 }
  0x36   : > { %p3883_p5 = pmov %p3881_p3 }
  0x37   : > { %2815 = vsyncadd (%p3882_p9), [#allocation6], 4294967232 }
  0x38   : > { %2817 = dma.done.wait (%p3883_p5), [#allocation9], 384   ;;  %p3884_p6 = pmov %p3881_p3 }
  0x39   : > { %p273_p10 = scmp.lt.s32.totalorder %s2932_s25, 1  ;;  %v2844_v0 = vmov 0   ;;  %vm304_vm0 = vcmask 1043456   ;;  %vm300_vm1 = vcmask 64512   ;;  %v284_v7 = vld [vmem:[%s3845_s3] sm:$0xff]  ;;  %s3869_s17 = smov 88   ;;  %v404_v15 = vlaneseq }
  0x3a   : > { %2819 = vsyncadd (%p3884_p6), [#allocation9], 4294966912  ;;  %349 = vmatprep.mubr.bf16.mxu0 %v2844_v0  ;;  %390 = vmatprep.mubr.bf16.mxu1 %v2844_v0  ;;  %v2705_v8 = vld [vmem:[#allocation8 + $0x10] ss:$0 sps:$4 sm:$0xff]   ;;  %v2706_v9 = vld [vmem:[#allocation8] ss:$8 sps:$4 sm:$0xff]  }
  0x3b   : > { %s274_s29 = scalar_select %p273_p10, %s2932_s25, 1  ;;  %2689 = vset.pattern.permute.xlu0 %v2844_v0  ;;  %2690 = vset.pattern.permute.xlu1 %v2844_v0  ;;  %v283_v12 = vld [vmem:[%s3844_s2] sm:$0xf]  ;;  %v2707_v13 = vld [vmem:[#allocation8] ss:$8 sps:$4 sm:$0xff]   ;;  %v405_v16 = vshrl.u32 %v404_v15, 7 }
  0x3c   : > { %287 = vperm.xlu0 %2689, %v284_v7   ;;  %1018 = vrot.lane.b32.xlu1 %v2706_v9, %s3869_s17  ;;  %s3852_s18 = smov 48   ;;  %v3026_v14 = vld [vmem:[#allocation5] sm:$0xf]  ;;  %s2847_s19 = smov 42   ;;  %vm428_vm2 = vcmask 338944   ;;  %vm430_vm3 = vcmask 683344  }
  0x3d   : > { %s2592_s9 = sshll.u32 %s274_s29, 4  ;;  %v2482_v17 = vadd.f32 -1.0, %v3026_v14  ;;  %v3029_v18 = vsub.s32 0, %v405_v16  ;;  %v414_v19 = vsub.s32 2, %v405_v16  ;;  %v410_v21 = vsub.s32 1, %v405_v16  ;;  %s2849_s20 = smov 124  }
  0x3e   : > { %s277_s12 = scalar_lea.vmem %s3842_s0, %s2592_s9  ;;  %v418_v22 = vsub.s32 3, %v405_v16  ;;  %v2848_v47 = vmov 4048220490   ;;  %429 = vst.msk [vmem:[#allocation2] sm:$0xf] %vm428_vm2, %v2844_v0  ;;  %vm460_vm4 = vcmask 1043792  }
  0x3f   : > { %v280_v1 = vld [vmem:[%s277_s12] sm:$0xff]  ;;  %v281_v2 = vld [vmem:[%s277_s12 + $0x8] sm:$0xff]  ;;  %v467_v20 = vmul.f32 1e+30, %v2482_v17  ;;  %v407_v42 = vrot.slane %v3026_v14, %v3029_v18  ;;  %v415_v43 = vrot.slane %v3026_v14, %v414_v19  ;;  %v411_v45 = vrot.slane %v3026_v14, %v410_v21  ;;  %494 = vst.msk [vmem:[#allocation3 + $0x10] sm:$0xf] %vm430_vm3, %v2848_v47 }
  0x40   : > { %v2473_v3 = vcombine.high %v280_v1, %v280_v1  ;;  %v2475_v4 = vcombine.high %v281_v2, %v281_v2  ;;  %v2472_v5 = vcombine.low %v280_v1, %v280_v1  ;;  %v2474_v6 = vcombine.low %v281_v2, %v281_v2  ;;  %1020 = vrot.lane.b32.xlu0 %v2705_v8, %s3869_s17  ;;  %s3862_s26 = smov 126   ;;  %s3866_s28 = smov 125   ;;  %v554_v56 = vld [vmem:[%s3847_s5] sm:$0xff] }
  0x41   : > { %v480_v23 = vrot.slane %v467_v20, %v414_v19  ;;  %v476_v24 = vrot.slane %v467_v20, %v410_v21  ;;  %v472_v25 = vrot.slane %v467_v20, %v3029_v18  ;;  %v484_v26 = vrot.slane %v467_v20, %v418_v22  ;;  %431 = vst.msk [vmem:[#allocation2 + $0x10] sm:$0xf] %vm430_vm3, %v2844_v0  ;;  %s3864_s29 = smov 127   ;;  %s2853_s9 = smov 104  }
  0x42   : > { %2476 = vmatprep.subr.msk.bf16.mxu0 %vm304_vm0, %v2473_v3  ;;  %2478 = vmatprep.subr.msk.bf16.mxu1 %vm304_vm0, %v2475_v4  ;;  %v306_v10 = vsel %vm304_vm0, %v2472_v5, 0  ;;  %v312_v11 = vsel %vm304_vm0, %v2474_v6, 0  ;;  %v419_v46 = vrot.slane %v3026_v14, %v418_v22  ;;  %493 = vst.msk [vmem:[#allocation3] sm:$0xf] %vm428_vm2, %v2848_v47  ;;  %vm461_vm5 = vcmask 1047556   ;;  %s3867_s10 = smov 106  }
  0x43   : > { %332 = vmatpush1.bf16.msra.mxu0 %v306_v10  ;;  %373 = vmatpush1.bf16.msra.mxu1 %v312_v11  ;;  %v491_v27 = vpack.c.bf16 %v480_v23, %v480_v23  ;;  %v490_v28 = vpack.c.bf16 %v476_v24, %v476_v24  ;;  %v489_v29 = vpack.c.bf16 %v472_v25, %v472_v25  ;;  %vm452_vm6 = vcmask 343040   ;;  %vm3056_vm7 = vmor %vm461_vm5, %vm460_vm4  ;;  %s2855_s11 = smov 105   ;;  %s2856_s12 = smov 108   ;;  %v2709_v47 = vld [vmem:[#allocation8] ss:$8 sps:$4 sm:$0xff]  }
  0x44   : > { %1345 = vrot.lane.b32.xlu0 %v2707_v13, %s3852_s18  ;;  %v492_v30 = vpack.c.bf16 %v484_v26, %v484_v26  ;;  %s3854_s13 = smov 107   ;;  %s3871_s14 = smov 84   ;;  %vm649_vm8 = vcmask 1014784   ;;  %vm625_vm9 = vcmask 1022976   ;;  %vm601_vm10 = vcmask 1031168  }
  0x45   : > { %v510_v31 = vpack.i.b16 %v491_v27, %v491_v27  ;;  %v496_v32 = vpack.i.b16 %v489_v29, %v489_v29  ;;  %v503_v33 = vpack.i.b16 %v490_v28, %v490_v28  ;;  %s3856_s15 = smov 85   ;;  %s3858_s16 = smov 86   ;;  %vm577_vm11 = vcmask 1039360  }
  0x46   : > { %2477 = vmatmul.mubr.msk.bf16.vlgmr.msra.gmra.mxu0 %vm300_vm1, %v283_v12  ;;  %2479 = vmatmul.mubr.msk.bf16.vlgmr.msra.gmra.mxu1 %vm300_vm1, %v283_v12  ;;  %v517_v34 = vpack.i.b16 %v492_v30, %v492_v30  ;;  %s2862_s18 = smov 64   ;;  %vm989_vm12 = vcmask 850944   ;;  %vm728_vm13 = vcmask 326656   ;;  %vm965_vm14 = vcmask 859136   ;;  %p3944_p13 = scmp.ne.s32.totalorder %s3876_s7, 0 }
  0x47   : > { %779 = vmatprep.mubr.bf16.mxu0 %v2844_v0  ;;  %830 = vmatprep.mubr.bf16.mxu1 %v2844_v0  ;;  %v515_v35 = vrot.slane %v510_v31, %v3029_v18  ;;  %v501_v36 = vrot.slane %v496_v32, %v3029_v18  ;;  %v508_v37 = vrot.slane %v503_v33, %v3029_v18  ;;  %vm941_vm15 = vcmask 867328  }
  0x48   : > { %v522_v38 = vrot.slane %v517_v34, %v3029_v18  ;;  %vm917_vm3 = vcmask 875520   ;;  %vm892_vm4 = vcmask 883712   ;;  %vm1292_vm5 = vcmask 695296  }
  0x49   : > { %v2483_v39 = vcombine.low %v501_v36, %v508_v37 }
  0x4a   : > { %v2484_v40 = vcombine.low %v515_v35, %v522_v38 }
  0x4b   : > { %v535_v41 = vadd.bf16 %v2483_v39, %v280_v1 }
  0x4c   : > { %v536_v44 = vadd.bf16 %v2484_v40, %v281_v2 }
  0x4d   : > { %539 = vrot.lane.b32.xlu0 %v535_v41, %s2847_s19 }
  0x4e   : > { %541 = vrot.lane.b32.xlu1 %v536_v44, %s2847_s19 }
  0xae   : > { %v3051_v51 = vpop.permute.xlu1 %1018 }
  0xb7   : > { %v288_v48 = vpop.permute.xlu0 %287 }
  0xbb   : > { %v3047_v49 = vpop.permute.xlu0 %1020 }
  0xbf   : > { %v3049_v50 = vpop.permute.xlu0 %1345 }
  0xc0   : > { %v3053_v53 = vpop.permute.xlu1 %541 }
  0xc1   : > { %v544_v55 = vrot.slane %v3053_v53, 4 }
  0xc3   : > { %v540_v52 = vpop.permute.xlu0 %539  ;;  %553 = vst.msk [vmem:[#allocation3 + $0x10] sm:$0xf] %vm428_vm2, %v544_v55 }
  0xc4   : > { %v543_v54 = vrot.slane %v540_v52, 4 }
  0xc6   : > { %v545_v57 = vsel %vm452_vm6, %v543_v54, %v540_v52  ;;  %v3063_v58 = vsel %vm304_vm0, %v543_v54, %v544_v55 }
  0xc7   : > { %551 = vst.msk [vmem:[#allocation3] sm:$0xff] %vm3056_vm7, %v545_v57 }
 0x106   : > { %v351_v59 = vpop.f32.mrf.mxu0  ;;  %v392_v60 = vpop.f32.mrf.mxu1 }
 0x107   : > { %v352_v61 = vadd.f32 %v351_v59, %v288_v48  ;;  %v393_v62 = vadd.f32 %v392_v60, %v288_v48 }
 0x108   : > { %v353_v63 = vpop.f32.mrf.mxu0  ;;  %v394_v1 = vpop.f32.mrf.mxu1 }
 0x109   : > { %v399_v2 = vmax.f32 %v352_v61, 0.0  ;;  %v401_v3 = vmax.f32 %v393_v62, 0.0  ;;  %v354_v4 = vadd.f32 %v353_v63, %v288_v48  ;;  %v395_v5 = vadd.f32 %v394_v1, %v288_v48  ;;  %v2711_v48 = vld [vmem:[#allocation8 + $0x4] ss:$8 sps:$4 sm:$0xff]  }
 0x10a   : > { %v396_v6 = vpop.f32.mrf.mxu1  ;;  %v355_v7 = vpop.f32.mrf.mxu0 }
 0x10b   : > { %v424_v8 = vmul.f32 %v407_v42, %v399_v2  ;;  %v400_v9 = vmax.f32 %v354_v4, 0.0  ;;  %v402_v10 = vmax.f32 %v395_v5, 0.0  ;;  %v426_v13 = vmul.f32 %v415_v43, %v401_v3 }
 0x10c   : > { %v397_v11 = vpop.f32.mrf.mxu1  ;;  %v356_v12 = vpop.f32.mrf.mxu0 }
 0x10d   : > { %v425_v14 = vmul.f32 %v411_v45, %v400_v9  ;;  %v427_v15 = vmul.f32 %v419_v46, %v402_v10  ;;  %v2708_v46 = vld [vmem:[#allocation8 + $0x10] ss:$0 sps:$4 sm:$0xff]  }
 0x10e   : > { %v1653_v10 = vld [vmem:[#allocation8 + $0x10] sm:$0xff] }
 0x10f   : > { %v2594_v16 = vpack.c.bf16 %v427_v15, %v426_v13  ;;  %v2593_v17 = vpack.c.bf16 %v425_v14, %v424_v8  ;;  %v2548_v13 = vcombine.high %v1653_v10, %v1653_v10 }
 0x111   : > { %448 = vrot.lane.b32.xlu1 %v2594_v16, %s2847_s19  ;;  %446 = vrot.lane.b32.xlu0 %v2593_v17, %s2847_s19  ;;  %s3860_s19 = smov 87   ;;  %v2547_v16 = vcombine.low %v1653_v10, %v1653_v10 }
 0x183   : > { %v449_v18 = vpop.permute.xlu1 %448  ;;  %v447_v19 = vpop.permute.xlu0 %446 }
 0x184   : > { %v451_v20 = vrot.slane %v449_v18, 4  ;;  %v450_v21 = vrot.slane %v447_v19, 4 }
 0x186   : > { %465 = vst.msk [vmem:[#allocation2 + $0x10] sm:$0xf] %vm428_vm2, %v451_v20  ;;  %v453_v22 = vsel %vm452_vm6, %v450_v21, %v447_v19  ;;  %v455_v23 = vsel %vm304_vm0, %v450_v21, %v451_v20  ;;  %v3240_v19 = vld [vmem:[#allocation3] sm:$0xff] }
 0x187   : > { %v3073_v24 = vsel %vm452_vm6, %v455_v23, %v449_v18  ;;  %463 = vst.msk [vmem:[#allocation2] sm:$0xff] %vm3056_vm7, %v453_v22  ;;  %v2714_v20 = vld [vmem:[#allocation8 + $0x4] ss:$8 sps:$4 sm:$0xff]   ;;  %v3247_v23 = vld [vmem:[#allocation3 + $0x10] sm:$0xf] }
 0x18d   : > { %v635_v25 = vld [vmem:[#allocation2 + $0x10] sm:$0xf] }
 0x18e   : > { %v587_v26 = vld [vmem:[#allocation2 + $0x10] sm:$0xf]  ;;  %643 = vrot.lane.b32.xlu1 %v635_v25, %s2849_s20  ;;  %v3095_v44 = vld [vmem:[#allocation2] sm:$0xff] }
 0x18f   : > { %595 = vrot.lane.b32.xlu0 %v587_v26, %s3862_s26  ;;  %v611_v27 = vld [vmem:[#allocation2 + $0x10] sm:$0xf] }
 0x190   : > { %v563_v28 = vld [vmem:[#allocation2 + $0x10] sm:$0xf] }
 0x191   : > { %v975_v29 = vld [vmem:[#allocation2 + $0x10] sm:$0xf] }
 0x192   : > { %619 = vrot.lane.b32.xlu1 %v611_v27, %s3866_s28  ;;  %v927_v30 = vld [vmem:[#allocation2 + $0x10] sm:$0xf]  ;;  %v3258_v27 = vsel %vm452_vm6, %v3063_v58, %v3053_v53  ;;  %vm1316_vm6 = vcmask 687104  }
 0x193   : > { %571 = vrot.lane.b32.xlu0 %v563_v28, %s3864_s29  ;;  %v951_v31 = vld [vmem:[#allocation2 + $0x10] sm:$0xf]  ;;  %v2715_v28 = vld [vmem:[#allocation8 + $0x14] ss:$0 sps:$4 sm:$0xff]  }
 0x194   : > { %v878_v32 = vld [vmem:[#allocation2 + $0x10] sm:$0xf] }
 0x195   : > { %v903_v33 = vld [vmem:[#allocation2 + $0x10] sm:$0xf] }
 0x196   : > { %983 = vrot.lane.b32.xlu1 %v975_v29, %s2853_s9  ;;  %v1302_v34 = vld [vmem:[#allocation2 + $0x10] sm:$0xf] }
 0x197   : > { %935 = vrot.lane.b32.xlu0 %v927_v30, %s3867_s10  ;;  %v1278_v35 = vld [vmem:[#allocation2 + $0x10] sm:$0xf] }
 0x198   : > { %v1254_v36 = vld [vmem:[#allocation2 + $0x10] sm:$0xf] }
 0x199   : > { %v1230_v37 = vld [vmem:[#allocation2 + $0x10] sm:$0xf] }
 0x19a   : > { %959 = vrot.lane.b32.xlu1 %v951_v31, %s2855_s11  ;;  %v1206_v38 = vld [vmem:[#allocation2 + $0x10] sm:$0xf] }
 0x19b   : > { %886 = vrot.lane.b32.xlu0 %v878_v32, %s2856_s12  ;;  %v1629_v39 = vld [vmem:[#allocation2 + $0x10] sm:$0xf] }
 0x19c   : > { %v1605_v40 = vld [vmem:[#allocation2 + $0x10] sm:$0xf] }
 0x19d   : > { %v1581_v41 = vld [vmem:[#allocation2 + $0x10] sm:$0xf] }
 0x19e   : > { %911 = vrot.lane.b32.xlu1 %v903_v33, %s3854_s13  ;;  %s3872_s13 = smov 65   ;;  %v1557_v42 = vld [vmem:[#allocation2 + $0x10] sm:$0xf] }
 0x19f   : > { %1310 = vrot.lane.b32.xlu0 %v1302_v34, %s3871_s14  ;;  %v1533_v43 = vld [vmem:[#allocation2 + $0x10] sm:$0xf] }
 0x1a0   : > { %v1968_v45 = vld [vmem:[#allocation2 + $0x10] sm:$0xf] }
 0x1a1   : > { %v1944_v55 = vld [vmem:[#allocation2 + $0x10] sm:$0xf] }
 0x1a2   : > { %1286 = vrot.lane.b32.xlu1 %v1278_v35, %s3856_s15  ;;  %s2864_s15 = smov 66   ;;  %v1920_v60 = vld [vmem:[#allocation2 + $0x10] sm:$0xf] }
 0x1a3   : > { %1262 = vrot.lane.b32.xlu0 %v1254_v36, %s3858_s16  ;;  %s3873_s16 = smov 67   ;;  %v1872_v6 = vld [vmem:[#allocation2 + $0x10] sm:$0xf] }
 0x1a4   : > { %v1896_v7 = vld [vmem:[#allocation2 + $0x10] sm:$0xf] }
 0x1a6   : > { %1238 = vrot.lane.b32.xlu1 %v1230_v37, %s3860_s19  ;;  %s3874_s19 = smov 68  }
 0x1a7   : > { %1214 = vrot.lane.b32.xlu0 %v1206_v38, %s3869_s17 }
 0x1aa   : > { %1637 = vrot.lane.b32.xlu1 %v1629_v39, %s2862_s18 }
 0x1ab   : > { %1613 = vrot.lane.b32.xlu0 %v1605_v40, %s3872_s13 }
 0x1ae   : > { %1589 = vrot.lane.b32.xlu1 %v1581_v41, %s2864_s15 }
 0x1af   : > { %1565 = vrot.lane.b32.xlu0 %v1557_v42, %s3873_s16 }
 0x1b2   : > { %1541 = vrot.lane.b32.xlu1 %v1533_v43, %s3874_s19 }
 0x1b3   : > { %591 = vrot.lane.b32.xlu0 %v3095_v44, %s3862_s26  ;;  %s3887_s26 = smov 107  }
 0x1b6   : > { %639 = vrot.lane.b32.xlu1 %v3095_v44, %s2849_s20 }
 0x1b7   : > { %567 = vrot.lane.b32.xlu0 %v3095_v44, %s3864_s29  ;;  %s3888_s29 = smov 86  }
 0x1ba   : > { %615 = vrot.lane.b32.xlu1 %v3095_v44, %s3866_s28  ;;  %s3889_s28 = smov 85  }
 0x1bb   : > { %931 = vrot.lane.b32.xlu0 %v3095_v44, %s3867_s10  ;;  %s3890_s10 = smov 87  }
 0x1be   : > { %979 = vrot.lane.b32.xlu1 %v3095_v44, %s2853_s9 }
 0x1bf   : > { %882 = vrot.lane.b32.xlu0 %v3095_v44, %s2856_s12 }
 0x1c2   : > { %955 = vrot.lane.b32.xlu1 %v3095_v44, %s2855_s11 }
 0x1c3   : > { %1306 = vrot.lane.b32.xlu0 %v3095_v44, %s3871_s14  ;;  %s3892_s14 = smov 126  }
 0x1c6   : > { %907 = vrot.lane.b32.xlu1 %v3095_v44, %s3887_s26 }
 0x1c7   : > { %1258 = vrot.lane.b32.xlu0 %v3095_v44, %s3888_s29 }
 0x1ca   : > { %1282 = vrot.lane.b32.xlu1 %v3095_v44, %s3889_s28 }
 0x1cb   : > { %1210 = vrot.lane.b32.xlu0 %v3095_v44, %s3869_s17  ;;  %s3891_s17 = smov 125  }
 0x1ce   : > { %1234 = vrot.lane.b32.xlu1 %v3095_v44, %s3890_s10 }
 0x1cf   : > { %1609 = vrot.lane.b32.xlu0 %v3095_v44, %s3872_s13  ;;  %s3875_s13 = smov 44  }
 0x1d2   : > { %1633 = vrot.lane.b32.xlu1 %v3095_v44, %s2862_s18 }
 0x1d3   : > { %1561 = vrot.lane.b32.xlu0 %v3095_v44, %s3873_s16  ;;  %s3893_s16 = smov 127  }
 0x1d6   : > { %1585 = vrot.lane.b32.xlu1 %v3095_v44, %s2864_s15 }
 0x1d7   : > { %641 = vrot.lane.b32.xlu0 %v3073_v24, %s2849_s20  ;;  %s3894_s20 = smov 48  }
 0x1da   : > { %1537 = vrot.lane.b32.xlu1 %v3095_v44, %s3874_s19  ;;  %s3895_s19 = smov 106  }
 0x1db   : > { %617 = vrot.lane.b32.xlu0 %v3073_v24, %s3891_s17  ;;  %s2868_s17 = smov 8  }
 0x1de   : > { %593 = vrot.lane.b32.xlu1 %v3073_v24, %s3892_s14 }
 0x1df   : > { %1972 = vrot.lane.b32.xlu0 %v3095_v44, %s3875_s13 }
 0x1e2   : > { %569 = vrot.lane.b32.xlu1 %v3073_v24, %s3893_s16 }
 0x1e3   : > { %1976 = vrot.lane.b32.xlu0 %v1968_v45, %s3875_s13  ;;  %s2870_s13 = smov 45  }
 0x1e6   : > { %1347 = vrot.lane.b32.xlu1 %v2708_v46, %s3894_s20 }
 0x1e7   : > { %981 = vrot.lane.b32.xlu0 %v3073_v24, %s2853_s9  ;;  %s2869_s9 = smov 46  }
 0x1ea   : > { %1677 = vrot.lane.b32.xlu1 %v2709_v47, %s2868_s17 }
 0x1eb   : > { %957 = vrot.lane.b32.xlu0 %v3073_v24, %s2855_s11  ;;  %s3896_s11 = smov 84  }
 0x1ee   : > { %933 = vrot.lane.b32.xlu1 %v3073_v24, %s3895_s19 }
 0x1ef   : > { %909 = vrot.lane.b32.xlu0 %v3073_v24, %s3887_s26  ;;  %s3897_s26 = smov 88  }
 0x1f2   : > { %884 = vrot.lane.b32.xlu1 %v3073_v24, %s2856_s12  ;;  %s3901_s12 = smov 44  }
 0x1f3   : > { %1679 = vrot.lane.b32.xlu0 %v2711_v48, %s2868_s17 }
 0x1f6   : > { %1924 = vrot.lane.b32.xlu1 %v3095_v44, %s2869_s9 }
 0x1f7   : > { %1284 = vrot.lane.b32.xlu0 %v3073_v24, %s3889_s28  ;;  %s3898_s28 = smov 65  }
 0x1fa   : > { %1308 = vrot.lane.b32.xlu1 %v3073_v24, %s3896_s11 }
 0x1fb   : > { %1948 = vrot.lane.b32.xlu0 %v3095_v44, %s2870_s13 }
 0x1fe   : > { %1260 = vrot.lane.b32.xlu1 %v3073_v24, %s3888_s29  ;;  %s3899_s29 = smov 68  }
 0x1ff   : > { %1236 = vrot.lane.b32.xlu0 %v3073_v24, %s3890_s10  ;;  %s2871_s10 = smov 47  }
 0x200   : > { %v3172_v52 = vpop.permute.xlu1 %643 }
 0x201   : > { %v3174_v54 = vpop.permute.xlu0 %595  ;;  %v647_v41 = vrot.slane %v3172_v52, 4 }
 0x202   : > { %1212 = vrot.lane.b32.xlu1 %v3073_v24, %s3897_s26 }
 0x203   : > { %1952 = vrot.lane.b32.xlu0 %v1944_v55, %s2870_s13 }
 0x204   : > { %v3179_v57 = vpop.permute.xlu1 %619 }
 0x205   : > { %v3181_v59 = vpop.permute.xlu0 %571 }
 0x206   : > { %1928 = vrot.lane.b32.xlu1 %v1920_v60, %s2869_s9 }
 0x207   : > { %1635 = vrot.lane.b32.xlu0 %v3073_v24, %s2862_s18  ;;  %s3900_s18 = smov 67  }
 0x208   : > { %v3186_v61 = vpop.permute.xlu1 %983 }
 0x209   : > { %v3188_v62 = vpop.permute.xlu0 %935 }
 0x20a   : > { %1876 = vrot.lane.b32.xlu1 %v3095_v44, %s3894_s20 }
 0x20b   : > { %1587 = vrot.lane.b32.xlu0 %v3073_v24, %s2864_s15  ;;  %s2874_s15 = smov 109  }
 0x20c   : > { %v3194_v63 = vpop.permute.xlu1 %959 }
 0x20d   : > { %v3196_v1 = vpop.permute.xlu0 %886 }
 0x20e   : > { %1611 = vrot.lane.b32.xlu1 %v3073_v24, %s3898_s28 }
 0x20f   : > { %1539 = vrot.lane.b32.xlu0 %v3073_v24, %s3899_s29  ;;  %s2595_s29 = sshll.u32 %s2932_s25, 9 }
 0x210   : > { %v3202_v2 = vpop.permute.xlu1 %911 }
 0x211   : > { %v3204_v3 = vpop.permute.xlu0 %1310 }
 0x212   : > { %1563 = vrot.lane.b32.xlu1 %v3073_v24, %s3900_s18 }
 0x213   : > { %1900 = vrot.lane.b32.xlu0 %v3095_v44, %s2871_s10 }
 0x214   : > { %v3209_v4 = vpop.permute.xlu1 %1286 }
 0x215   : > { %v3211_v5 = vpop.permute.xlu0 %1262 }
 0x216   : > { %1880 = vrot.lane.b32.xlu1 %v1872_v6, %s3894_s20 }
 0x217   : > { %1904 = vrot.lane.b32.xlu0 %v1896_v7, %s2871_s10 }
 0x218   : > { %v3214_v8 = vpop.permute.xlu1 %1238 }
 0x219   : > { %v3216_v9 = vpop.permute.xlu0 %1214 }
 0x21a   : > { %1974 = vrot.lane.b32.xlu1 %v3073_v24, %s3901_s12 }
 0x21b   : > { %1926 = vrot.lane.b32.xlu0 %v3073_v24, %s2869_s9 }
 0x21c   : > { %v3222_v11 = vpop.permute.xlu1 %1637 }
 0x21d   : > { %v3224_v12 = vpop.permute.xlu0 %1613 }
 0x21e   : > { %1950 = vrot.lane.b32.xlu1 %v3073_v24, %s2870_s13  ;;  %s2872_s13 = smov 96  }
 0x21f   : > { %1878 = vrot.lane.b32.xlu0 %v3073_v24, %s3894_s20 }
 0x220   : > { %v3230_v14 = vpop.permute.xlu1 %1589 }
 0x221   : > { %v3232_v15 = vpop.permute.xlu0 %1565 }
 0x222   : > { %1902 = vrot.lane.b32.xlu1 %v3073_v24, %s2871_s10 }
 0x223   : > { %1683 = vrot.lane.b32.xlu0 %v2548_v13, %s2868_s17 }
 0x224   : > { %v3236_v17 = vpop.permute.xlu1 %1541 }
 0x225   : > { %v3238_v18 = vpop.permute.xlu0 %591 }
 0x226   : > { %1681 = vrot.lane.b32.xlu1 %v2547_v16, %s2868_s17 }
 0x227   : > { %2223 = vrot.lane.b32.xlu0 %v3240_v19, %s3893_s16 }
 0x228   : > { %v640_v21 = vpop.permute.xlu1 %639 }
 0x229   : > { %v3245_v22 = vpop.permute.xlu0 %567  ;;  %v645_v42 = vrot.slane %v640_v21, 4 }
 0x22a   : > { %2011 = vrot.lane.b32.xlu1 %v2714_v20, %s2872_s13  ;;  %v623_v20 = vrot.slane %v3179_v57, 4  ;;  %v597_v57 = vrot.slane %v3238_v18, 4 }
 0x22b   : > { %2227 = vrot.lane.b32.xlu0 %v3247_v23, %s3893_s16 }
 0x22c   : > { %v3251_v25 = vpop.permute.xlu1 %615 }
 0x22d   : > { %v3253_v26 = vpop.permute.xlu0 %931 }
 0x22e   : > { %2225 = vrot.lane.b32.xlu1 %v3258_v27, %s3893_s16  ;;  %s2875_s16 = smov [#allocation10]  }
 0x22f   : > { %2242 = vrot.lane.b32.xlu0 %v3240_v19, %s3892_s14  ;;  %s2774_s20 = sshll.u32 %s2875_s16, 4  ;;  %s2775_s20 = int_to_ptr.vmem [resolvable:$false] %s2774_s20 }
 0x230   : > { %v3264_v29 = vpop.permute.xlu1 %979  ;;  %s2776_s17 = scalar_lea.vmem %s2775_s20, 1024 }
 0x231   : > { %v3266_v30 = vpop.permute.xlu0 %882 }
 0x232   : > { %2013 = vrot.lane.b32.xlu1 %v2715_v28, %s2872_s13  ;;  %v621_v28 = vrot.slane %v3251_v25, 4  ;;  %s3799_s13 = scalar_lea.hbm %s3848_s6, %s2595_s29 }
 0x233   : > { %2246 = vrot.lane.b32.xlu0 %v3247_v23, %s3892_s14 }
 0x234   : > { %v3270_v31 = vpop.permute.xlu1 %955 }
 0x235   : > { %v3272_v32 = vpop.permute.xlu0 %1306 }
 0x236   : > { %2244 = vrot.lane.b32.xlu1 %v3258_v27, %s3892_s14  ;;  %s2873_s14 = smov 1  }
 0x238   : > { %v3276_v53 = vpop.permute.xlu1 %907 }
 0x239   : > { %v3278_v58 = vpop.permute.xlu0 %1258 }
 0x23c   : > { %v3280_v33 = vpop.permute.xlu1 %1282 }
 0x23d   : > { %v3282_v34 = vpop.permute.xlu0 %1210 }
 0x240   : > { %v3284_v35 = vpop.permute.xlu1 %1234 }
 0x241   : > { %v3286_v36 = vpop.permute.xlu0 %1609 }
 0x244   : > { %v3288_v37 = vpop.permute.xlu1 %1633 }
 0x245   : > { %v3290_v38 = vpop.permute.xlu0 %1561 }
 0x248   : > { %v3292_v39 = vpop.permute.xlu1 %1585 }
 0x249   : > { %v642_v40 = vpop.permute.xlu0 %641 }
 0x24a   : > { %v646_v43 = vrot.slane %v642_v40, 4 }
 0x24c   : > { %v648_v45 = vsel %vm304_vm0, %v645_v42, %v646_v43  ;;  %v651_v46 = vsel %vm304_vm0, %v646_v43, %v647_v41  ;;  %v3297_v55 = vpop.permute.xlu1 %1537  ;;  %v599_v42 = vrot.slane %v3174_v54, 4 }
 0x24d   : > { %v650_v47 = vsel %vm649_vm8, %v640_v21, %v648_v45  ;;  %v652_v48 = vsel %vm649_vm8, %v642_v40, %v651_v46  ;;  %v618_v60 = vpop.permute.xlu0 %617  ;;  %vm1268_vm8 = vcmask 703488  }
 0x24e   : > { %v2496_v6 = vcombine.high %v650_v47, %v650_v47  ;;  %v2497_v7 = vcombine.low %v652_v48, %v652_v48  ;;  %v2498_v10 = vcombine.high %v652_v48, %v652_v48  ;;  %v622_v13 = vrot.slane %v618_v60, 4 }
 0x24f   : > { %v2495_v16 = vcombine.low %v650_v47, %v650_v47  ;;  %v575_v47 = vrot.slane %v3181_v59, 4 }
 0x250   : > { %2499 = vmatprep.subr.msk.bf16.mxu0 %vm304_vm0, %v2496_v6  ;;  %2502 = vmatprep.subr.msk.bf16.mxu1 %vm304_vm0, %v2498_v10  ;;  %v742_v52 = vsel %vm304_vm0, %v2497_v7, 0  ;;  %v594_v21 = vpop.permute.xlu1 %593  ;;  %v627_v43 = vsel %vm304_vm0, %v622_v13, %v623_v20  ;;  %v624_v46 = vsel %vm304_vm0, %v621_v28, %v622_v13  ;;  %v573_v7 = vrot.slane %v3245_v22, 4 }
 0x251   : > { %v736_v40 = vsel %vm304_vm0, %v2495_v16, 0  ;;  %809 = vmatpush1.bf16.msra.mxu1 %v742_v52  ;;  %v3305_v41 = vpop.permute.xlu0 %1972  ;;  %v598_v45 = vrot.slane %v594_v21, 4  ;;  %v628_v10 = vsel %vm625_vm9, %v618_v60, %v627_v43  ;;  %v985_v43 = vrot.slane %v3264_v29, 4 }
 0x252   : > { %758 = vmatpush1.bf16.msra.mxu0 %v736_v40  ;;  %v626_v40 = vsel %vm625_vm9, %v3251_v25, %v624_v46  ;;  %vm1244_vm9 = vcmask 711680  }
 0x253   : > { %v600_v48 = vsel %vm304_vm0, %v597_v57, %v598_v45  ;;  %v603_v6 = vsel %vm304_vm0, %v598_v45, %v599_v42 }
 0x254   : > { %v604_v54 = vsel %vm601_vm10, %v594_v21, %v603_v6  ;;  %v570_v16 = vpop.permute.xlu1 %569  ;;  %v602_v20 = vsel %vm601_vm10, %v3238_v18, %v600_v48  ;;  %v987_v21 = vrot.slane %v3186_v61, 4 }
 0x255   : > { %v3317_v52 = vpop.permute.xlu0 %1976  ;;  %v2493_v13 = vcombine.low %v604_v54, %v628_v10  ;;  %v2494_v28 = vcombine.high %v604_v54, %v628_v10  ;;  %v574_v59 = vrot.slane %v570_v16, 4  ;;  %v2491_v42 = vcombine.low %v602_v20, %v626_v40 }
 0x256   : > { %v2492_v57 = vcombine.high %v602_v20, %v626_v40  ;;  %v2716_v20 = vld [vmem:[#allocation8] ss:$8 sps:$4 sm:$0xff]  }
 0x257   : > { %v576_v45 = vsel %vm304_vm0, %v573_v7, %v574_v59  ;;  %v579_v60 = vsel %vm304_vm0, %v574_v59, %v575_v47  ;;  %810 = vmatprep.subr.bf16.mxu1 %v2494_v28 }
 0x258   : > { %v580_v18 = vsel %vm577_vm11, %v570_v16, %v579_v60  ;;  %759 = vmatprep.subr.bf16.mxu0 %v2492_v57  ;;  %v3328_v48 = vpop.permute.xlu1 %1347  ;;  %811 = vmatpush1.bf16.msra.mxu1 %v2493_v13  ;;  %v578_v25 = vsel %vm577_vm11, %v3245_v22, %v576_v45  ;;  %v963_v45 = vrot.slane %v3194_v63, 4  ;;  %v961_v60 = vrot.slane %v3270_v31, 4 }
 0x259   : > { %v982_v6 = vpop.permute.xlu0 %981  ;;  %v2489_v46 = vcombine.low %v3073_v24, %v580_v18  ;;  %v2490_v47 = vcombine.high %v3073_v24, %v580_v18  ;;  %760 = vmatpush1.bf16.msra.mxu0 %v2491_v42  ;;  %v2487_v61 = vcombine.low %v3095_v44, %v578_v25  ;;  %v2488_v10 = vcombine.high %v3095_v44, %v578_v25 }
 0x25a   : > { %v986_v7 = vrot.slane %v982_v6, 4 }
 0x25b   : > { %812 = vmatprep.subr.bf16.mxu1 %v2490_v47  ;;  %761 = vmatprep.subr.bf16.mxu0 %v2488_v10  ;;  %v888_v10 = vrot.slane %v3266_v30, 4 }
 0x25c   : > { %v988_v54 = vsel %vm304_vm0, %v985_v43, %v986_v7  ;;  %v991_v16 = vsel %vm304_vm0, %v986_v7, %v987_v21  ;;  %v3341_v28 = vpop.permute.xlu1 %1677  ;;  %813 = vmatpush1.bf16.msra.mxu1 %v2489_v46  ;;  %v939_v21 = vrot.slane %v3188_v62, 4  ;;  %v937_v43 = vrot.slane %v3253_v26, 4 }
 0x25d   : > { %v990_v13 = vsel %vm989_vm12, %v3264_v29, %v988_v54  ;;  %v992_v22 = vsel %vm989_vm12, %v982_v6, %v991_v16  ;;  %v958_v24 = vpop.permute.xlu0 %957  ;;  %762 = vmatpush1.bf16.msra.mxu0 %v2487_v61  ;;  %v890_v62 = vrot.slane %v3196_v1, 4  ;;  %v915_v61 = vrot.slane %v3202_v2, 4 }
 0x25e   : > { %v2516_v59 = vcombine.high %v990_v13, %v990_v13  ;;  %v2517_v40 = vcombine.low %v992_v22, %v992_v22  ;;  %v2518_v44 = vcombine.high %v992_v22, %v992_v22  ;;  %v962_v42 = vrot.slane %v958_v24, 4 }
 0x25f   : > { %v2515_v57 = vcombine.low %v990_v13, %v990_v13  ;;  %2503 = vmatmul.mubr.msk.bf16.vlgmr.msra.gmra.mxu1 %vm728_vm13, %v2716_v20  ;;  %v913_v54 = vrot.slane %v3276_v53, 4  ;;  %v2717_v13 = vld [vmem:[#allocation8 + $0x10] ss:$0 sps:$4 sm:$0xff]   ;;  %vm1220_vm12 = vcmask 719872  }
 0x260   : > { %2519 = vmatprep.subr.msk.bf16.mxu0 %vm304_vm0, %v2516_v59  ;;  %v1085_v29 = vsel %vm304_vm0, %v2517_v40, 0  ;;  %2500 = vmatmul.mubr.msk.bf16.vlgmr.msra.gmra.mxu0 %vm728_vm13, %v2716_v20  ;;  %v934_v18 = vpop.permute.xlu1 %933  ;;  %v964_v25 = vsel %vm304_vm0, %v961_v60, %v962_v42  ;;  %v967_v46 = vsel %vm304_vm0, %v962_v42, %v963_v45 }
 0x261   : > { %2522 = vmatprep.subr.msk.bf16.mxu1 %vm304_vm0, %v2518_v44  ;;  %v1079_v63 = vsel %vm304_vm0, %v2515_v57, 0  ;;  %v910_v6 = vpop.permute.xlu0 %909  ;;  %v938_v47 = vrot.slane %v934_v18, 4  ;;  %789 = vmatprep.mubr.bf16.mxu0 %v2844_v0  ;;  %v968_v22 = vsel %vm965_vm14, %v958_v24, %v967_v46  ;;  %v966_v44 = vsel %vm965_vm14, %v3270_v31, %v964_v25 }
 0x262   : > { %1101 = vmatpush1.bf16.msra.mxu0 %v1079_v63  ;;  %1152 = vmatpush1.bf16.msra.mxu1 %v1085_v29  ;;  %v914_v7 = vrot.slane %v910_v6, 4  ;;  %vm1643_vm14 = vcmask 523264  }
 0x263   : > { %840 = vmatprep.mubr.bf16.mxu1 %v2844_v0  ;;  %v940_v16 = vsel %vm304_vm0, %v937_v43, %v938_v47  ;;  %v943_v20 = vsel %vm304_vm0, %v938_v47, %v939_v21 }
 0x264   : > { %v944_v1 = vsel %vm941_vm15, %v934_v18, %v943_v20  ;;  %v885_v2 = vpop.permute.xlu1 %884  ;;  %v942_v40 = vsel %vm941_vm15, %v3253_v26, %v940_v16  ;;  %v919_v45 = vsel %vm304_vm0, %v914_v7, %v915_v61  ;;  %v916_v29 = vsel %vm304_vm0, %v913_v54, %v914_v7 }
 0x265   : > { %v3365_v59 = vpop.permute.xlu0 %1679  ;;  %v2513_v42 = vcombine.low %v944_v1, %v968_v22  ;;  %v2514_v57 = vcombine.high %v944_v1, %v968_v22  ;;  %v889_v60 = vrot.slane %v885_v2, 4  ;;  %v2511_v21 = vcombine.low %v942_v40, %v966_v44 }
 0x266   : > { %v2512_v24 = vcombine.high %v942_v40, %v966_v44  ;;  %v920_v26 = vsel %vm917_vm3, %v910_v6, %v919_v45  ;;  %v1314_v16 = vrot.slane %v3204_v3, 4  ;;  %v1312_v20 = vrot.slane %v3272_v32, 4 }
 0x267   : > { %v891_v43 = vsel %vm304_vm0, %v888_v10, %v889_v60  ;;  %v894_v18 = vsel %vm304_vm0, %v889_v60, %v890_v62  ;;  %2504 = vmatmul.mubr.msk.bf16.gmra.mxu1 %vm728_vm13, %v2717_v13  ;;  %1153 = vmatprep.subr.bf16.mxu1 %v2514_v57  ;;  %v918_v62 = vsel %vm917_vm3, %v3276_v53, %v916_v29  ;;  %v1290_v53 = vrot.slane %v3209_v4, 4 }
 0x268   : > { %v895_v31 = vsel %vm892_vm4, %v885_v2, %v894_v18  ;;  %2501 = vmatmul.mubr.msk.bf16.gmra.mxu0 %vm728_vm13, %v2717_v13  ;;  %1102 = vmatprep.subr.bf16.mxu0 %v2512_v24  ;;  %v3379_v63 = vpop.permute.xlu1 %1924  ;;  %v893_v46 = vsel %vm892_vm4, %v3266_v30, %v891_v43  ;;  %v1266_v22 = vrot.slane %v3211_v5, 4  ;;  %v1242_v1 = vrot.slane %v3214_v8, 4 }
 0x269   : > { %v1285_v25 = vpop.permute.xlu0 %1284  ;;  %v2509_v47 = vcombine.low %v895_v31, %v920_v26  ;;  %v2510_v7 = vcombine.high %v895_v31, %v920_v26  ;;  %1103 = vmatpush1.bf16.msra.mxu0 %v2511_v21  ;;  %1154 = vmatpush1.bf16.msra.mxu1 %v2513_v42  ;;  %v2507_v61 = vcombine.low %v893_v46, %v918_v62  ;;  %v1264_v2 = vrot.slane %v3278_v58, 4 }
 0x26a   : > { %v2508_v6 = vcombine.high %v893_v46, %v918_v62  ;;  %1122 = vmatprep.mubr.bf16.mxu0 %v2844_v0  ;;  %1173 = vmatprep.mubr.bf16.mxu1 %v2844_v0  ;;  %v1289_v10 = vrot.slane %v1285_v25, 4  ;;  %v1288_v44 = vrot.slane %v3280_v33, 4  ;;  %v1216_v24 = vrot.slane %v3282_v34, 4 }
 0x26b   : > { %1155 = vmatprep.subr.bf16.mxu1 %v2510_v7  ;;  %vm1595_vm3 = vcmask 539648   ;;  %vm1619_vm4 = vcmask 531456  }
 0x26c   : > { %1104 = vmatprep.subr.bf16.mxu0 %v2508_v6  ;;  %v1309_v54 = vpop.permute.xlu1 %1308  ;;  %v1294_v42 = vsel %vm304_vm0, %v1289_v10, %v1290_v53  ;;  %v1291_v26 = vsel %vm304_vm0, %v1288_v44, %v1289_v10 }
 0x26d   : > { %v3387_v30 = vpop.permute.xlu0 %1948  ;;  %v1313_v13 = vrot.slane %v1309_v54, 4  ;;  %1105 = vmatpush1.bf16.msra.mxu0 %v2507_v61  ;;  %1156 = vmatpush1.bf16.msra.mxu1 %v2509_v47  ;;  %v1240_v47 = vrot.slane %v3284_v35, 4 }
 0x26f   : > { %v1315_v40 = vsel %vm304_vm0, %v1312_v20, %v1313_v13  ;;  %v1318_v3 = vsel %vm304_vm0, %v1313_v13, %v1314_v16  ;;  %v1641_v13 = vrot.slane %v3222_v11, 4 }
 0x270   : > { %v1317_v57 = vsel %vm1316_vm6, %v3272_v32, %v1315_v40  ;;  %v1319_v4 = vsel %vm1316_vm6, %v1309_v54, %v1318_v3  ;;  %2520 = vmatmul.mubr.msk.bf16.vlgmr.msra.gmra.mxu0 %vm728_vm13, %v3051_v51  ;;  %2523 = vmatmul.mubr.msk.bf16.vlgmr.msra.gmra.mxu1 %vm728_vm13, %v3051_v51  ;;  %v1261_v5 = vpop.permute.xlu1 %1260  ;;  %v1218_v32 = vrot.slane %v3216_v9, 4  ;;  %v1295_v9 = vsel %vm1292_vm5, %v1285_v25, %v1294_v42 }
 0x271   : > { %v1237_v8 = vpop.permute.xlu0 %1236  ;;  %v2536_v45 = vcombine.high %v1317_v57, %v1317_v57  ;;  %v2537_v60 = vcombine.low %v1319_v4, %v1319_v4  ;;  %v2538_v29 = vcombine.high %v1319_v4, %v1319_v4  ;;  %v1265_v21 = vrot.slane %v1261_v5, 4  ;;  %1132 = vmatprep.mubr.bf16.mxu0 %v2844_v0  ;;  %1183 = vmatprep.mubr.bf16.mxu1 %v2844_v0 }
 0x272   : > { %v1241_v43 = vrot.slane %v1237_v8, 4  ;;  %v2535_v18 = vcombine.low %v1317_v57, %v1317_v57  ;;  %vm1571_vm6 = vcmask 547840  }
 0x273   : > { %v1267_v51 = vsel %vm304_vm0, %v1264_v2, %v1265_v21  ;;  %v1270_v31 = vsel %vm304_vm0, %v1265_v21, %v1266_v22  ;;  %2539 = vmatprep.subr.msk.bf16.mxu0 %vm304_vm0, %v2536_v45  ;;  %2542 = vmatprep.subr.msk.bf16.mxu1 %vm304_vm0, %v2538_v29  ;;  %v1412_v46 = vsel %vm304_vm0, %v2537_v60, 0  ;;  %v1293_v22 = vsel %vm1292_vm5, %v3280_v33, %v1291_v26 }
 0x274   : > { %v1271_v7 = vsel %vm1268_vm8, %v1261_v5, %v1270_v31  ;;  %v1213_v62 = vpop.permute.xlu1 %1212  ;;  %v1406_v61 = vsel %vm304_vm0, %v2535_v18, 0  ;;  %1479 = vmatpush1.bf16.msra.mxu1 %v1412_v46  ;;  %v1246_v16 = vsel %vm304_vm0, %v1241_v43, %v1242_v1  ;;  %v1243_v53 = vsel %vm304_vm0, %v1240_v47, %v1241_v43 }
 0x275   : > { %v3420_v6 = vpop.permute.xlu0 %1952  ;;  %v2533_v10 = vcombine.low %v1271_v7, %v1295_v9  ;;  %v2534_v54 = vcombine.high %v1271_v7, %v1295_v9  ;;  %v1217_v20 = vrot.slane %v1213_v62, 4  ;;  %1428 = vmatpush1.bf16.msra.mxu0 %v1406_v61  ;;  %v1269_v25 = vsel %vm1268_vm8, %v3278_v58, %v1267_v51 }
 0x276   : > { %v2531_v3 = vcombine.low %v1269_v25, %v1293_v22  ;;  %v2532_v44 = vcombine.high %v1269_v25, %v1293_v22  ;;  %v1639_v1 = vrot.slane %v3288_v37, 4  ;;  %v1247_v42 = vsel %vm1244_vm9, %v1237_v8, %v1246_v16 }
 0x277   : > { %v1219_v2 = vsel %vm304_vm0, %v1216_v24, %v1217_v20  ;;  %v1222_v40 = vsel %vm304_vm0, %v1217_v20, %v1218_v32  ;;  %1480 = vmatprep.subr.bf16.mxu1 %v2534_v54  ;;  %v1245_v8 = vsel %vm1244_vm9, %v3284_v35, %v1243_v53  ;;  %v1593_v46 = vrot.slane %v3230_v14, 4 }
 0x278   : > { %v1223_v11 = vsel %vm1220_vm12, %v1213_v62, %v1222_v40  ;;  %2521 = vmatmul.mubr.msk.bf16.gmra.mxu0 %vm728_vm13, %v3047_v49  ;;  %2524 = vmatmul.mubr.msk.bf16.gmra.mxu1 %vm728_vm13, %v3047_v49  ;;  %v3438_v58 = vpop.permute.xlu1 %1928  ;;  %v1221_v57 = vsel %vm1220_vm12, %v3282_v34, %v1219_v2  ;;  %v1591_v47 = vrot.slane %v3292_v39, 4  ;;  %v1617_v9 = vrot.slane %v3224_v12, 4 }
 0x279   : > { %v1636_v33 = vpop.permute.xlu0 %1635  ;;  %v2529_v4 = vcombine.low %v1223_v11, %v1247_v42  ;;  %v2530_v5 = vcombine.high %v1223_v11, %v1247_v42  ;;  %1429 = vmatprep.subr.bf16.mxu0 %v2532_v44  ;;  %1481 = vmatpush1.bf16.msra.mxu1 %v2533_v10  ;;  %v2527_v60 = vcombine.low %v1221_v57, %v1245_v8  ;;  %v1615_v7 = vrot.slane %v3286_v36, 4 }
 0x27a   : > { %v1640_v45 = vrot.slane %v1636_v33, 4  ;;  %1430 = vmatpush1.bf16.msra.mxu0 %v2531_v3  ;;  %v2528_v29 = vcombine.high %v1221_v57, %v1245_v8  ;;  %1449 = vmatprep.mubr.bf16.mxu0 %v2844_v0  ;;  %v1569_v20 = vrot.slane %v3232_v15, 4  ;;  %vm1547_vm5 = vcmask 556032  }
 0x27b   : > { %1482 = vmatprep.subr.bf16.mxu1 %v2530_v5  ;;  %1500 = vmatprep.mubr.bf16.mxu1 %v2844_v0  ;;  %v1567_v53 = vrot.slane %v3290_v38, 4  ;;  %v1543_v25 = vrot.slane %v3297_v55, 4  ;;  %vm1982_vm8 = vcmask 359424   ;;  %vm1934_vm9 = vcmask 375808  }
 0x27c   : > { %v1642_v49 = vsel %vm304_vm0, %v1639_v1, %v1640_v45  ;;  %v1645_v21 = vsel %vm304_vm0, %v1640_v45, %v1641_v13  ;;  %1431 = vmatprep.subr.bf16.mxu0 %v2528_v29  ;;  %v3451_v24 = vpop.permute.xlu1 %1876  ;;  %v1545_v13 = vrot.slane %v3236_v17, 4 }
 0x27d   : > { %v1644_v34 = vsel %vm1643_vm14, %v3288_v37, %v1642_v49  ;;  %v1646_v32 = vsel %vm1643_vm14, %v1636_v33, %v1645_v21  ;;  %v1588_v35 = vpop.permute.xlu0 %1587  ;;  %1483 = vmatpush1.bf16.msra.mxu1 %v2529_v4  ;;  %vm1958_vm14 = vcmask 367616  }
 0x27e   : > { %v2558_v43 = vcombine.high %v1644_v34, %v1644_v34  ;;  %v2559_v18 = vcombine.low %v1646_v32, %v1646_v32  ;;  %v2560_v26 = vcombine.high %v1646_v32, %v1646_v32  ;;  %1432 = vmatpush1.bf16.msra.mxu0 %v2527_v60  ;;  %v1592_v51 = vrot.slane %v1588_v35, 4 }
 0x27f   : > { %v2557_v31 = vcombine.low %v1644_v34, %v1644_v34 }
 0x280   : > { %2561 = vmatprep.subr.msk.bf16.mxu0 %vm304_vm0, %v2558_v43  ;;  %2564 = vmatprep.subr.msk.bf16.mxu1 %vm304_vm0, %v2560_v26  ;;  %v1751_v37 = vsel %vm304_vm0, %v2559_v18, 0  ;;  %v1612_v62 = vpop.permute.xlu1 %1611  ;;  %v1594_v10 = vsel %vm304_vm0, %v1591_v47, %v1592_v51  ;;  %v1597_v54 = vsel %vm304_vm0, %v1592_v51, %v1593_v46  ;;  %v1980_v26 = vrot.slane %v3317_v52, 4 }
 0x281   : > { %2543 = vmatmul.mubr.msk.bf16.vlgmr.msra.gmra.mxu1 %vm728_vm13, %v3049_v50  ;;  %v1745_v14 = vsel %vm304_vm0, %v2557_v31, 0  ;;  %v1540_v61 = vpop.permute.xlu0 %1539  ;;  %2540 = vmatmul.mubr.msk.bf16.vlgmr.msra.gmra.mxu0 %vm728_vm13, %v3049_v50  ;;  %v1616_v16 = vrot.slane %v1612_v62, 4  ;;  %v1598_v2 = vsel %vm1595_vm3, %v1588_v35, %v1597_v54  ;;  %v1596_v3 = vsel %vm1595_vm3, %v3292_v39, %v1594_v10 }
 0x282   : > { %1818 = vmatpush1.bf16.msra.mxu1 %v1751_v37  ;;  %v1544_v12 = vrot.slane %v1540_v61, 4  ;;  %1767 = vmatpush1.bf16.msra.mxu0 %v1745_v14  ;;  %vm1886_vm3 = vcmask 392192   ;;  %v1686_v31 = vsel %vm300_vm1, %v3341_v28, %v3365_v59  ;;  %v1930_v46 = vrot.slane %v3379_v63, 4 }
 0x283   : > { %1459 = vmatprep.mubr.bf16.mxu0 %v2844_v0  ;;  %v1618_v22 = vsel %vm304_vm0, %v1615_v7, %v1616_v16  ;;  %v1621_v50 = vsel %vm304_vm0, %v1616_v16, %v1617_v9  ;;  %1510 = vmatprep.mubr.bf16.mxu1 %v2844_v0  ;;  %v1932_v47 = vrot.slane %v3438_v58, 4  ;;  %v1954_v37 = vrot.slane %v3387_v30, 4 }
 0x284   : > { %v1622_v15 = vsel %vm1619_vm4, %v1612_v62, %v1621_v50  ;;  %v1564_v17 = vpop.permute.xlu1 %1563  ;;  %v1620_v44 = vsel %vm1619_vm4, %v3286_v36, %v1618_v22  ;;  %v1549_v11 = vsel %vm304_vm0, %v1544_v12, %v1545_v13  ;;  %v1546_v57 = vsel %vm304_vm0, %v1543_v25, %v1544_v12 }
 0x285   : > { %v3477_v40 = vpop.permute.xlu0 %1900  ;;  %v2555_v1 = vcombine.low %v1598_v2, %v1622_v15  ;;  %v2556_v42 = vcombine.high %v1598_v2, %v1622_v15  ;;  %v1568_v33 = vrot.slane %v1564_v17, 4  ;;  %v2553_v4 = vcombine.low %v1596_v3, %v1620_v44 }
 0x286   : > { %v2554_v5 = vcombine.high %v1596_v3, %v1620_v44  ;;  %v1550_v60 = vsel %vm1547_vm5, %v1540_v61, %v1549_v11  ;;  %v1548_v32 = vsel %vm1547_vm5, %v3297_v55, %v1546_v57  ;;  %vm1910_vm4 = vcmask 384000  }
 0x287   : > { %v1570_v45 = vsel %vm304_vm0, %v1567_v53, %v1568_v33  ;;  %v1573_v8 = vsel %vm304_vm0, %v1568_v33, %v1569_v20  ;;  %1819 = vmatprep.subr.bf16.mxu1 %v2556_v42  ;;  %v1956_v9 = vrot.slane %v3420_v6, 4  ;;  %v1882_v62 = vrot.slane %v3451_v24, 4 }
 0x288   : > { %v1574_v39 = vsel %vm1571_vm6, %v1564_v17, %v1573_v8  ;;  %1768 = vmatprep.subr.bf16.mxu0 %v2554_v5  ;;  %v3491_v36 = vpop.permute.xlu1 %1880  ;;  %v1572_v49 = vsel %vm1571_vm6, %v3290_v38, %v1570_v45  ;;  %1820 = vmatpush1.bf16.msra.mxu1 %v2555_v1  ;;  %v1906_v12 = vrot.slane %v3477_v40, 4 }
 0x289   : > { %2544 = vmatmul.mubr.msk.bf16.gmra.mxu1 %vm728_vm13, %v3328_v48  ;;  %v3493_v29 = vpop.permute.xlu0 %1904  ;;  %v2551_v21 = vcombine.low %v1550_v60, %v1574_v39  ;;  %v2552_v34 = vcombine.high %v1550_v60, %v1574_v39  ;;  %2541 = vmatmul.mubr.msk.bf16.gmra.mxu0 %vm728_vm13, %v3328_v48  ;;  %v2549_v35 = vcombine.low %v1548_v32, %v1572_v49  ;;  %v1978_v48 = vrot.slane %v3305_v41, 4 }
 0x28a   : > { %1769 = vmatpush1.bf16.msra.mxu0 %v2553_v4  ;;  %v2550_v43 = vcombine.high %v1548_v32, %v1572_v49  ;;  %1788 = vmatprep.mubr.bf16.mxu0 %v2844_v0  ;;  %v1908_v2 = vrot.slane %v3493_v29, 4 }
 0x28b   : > { %1821 = vmatprep.subr.bf16.mxu1 %v2552_v34  ;;  %1839 = vmatprep.mubr.bf16.mxu1 %v2844_v0 }
 0x28c   : > { %1770 = vmatprep.subr.bf16.mxu0 %v2550_v43  ;;  %v1975_v38 = vpop.permute.xlu1 %1974  ;;  %1822 = vmatpush1.bf16.msra.mxu1 %v2551_v21 }
 0x28d   : > { %v1927_v18 = vpop.permute.xlu0 %1926  ;;  %v1979_v51 = vrot.slane %v1975_v38, 4 }
 0x28e   : > { %v1931_v55 = vrot.slane %v1927_v18, 4  ;;  %1771 = vmatpush1.bf16.msra.mxu0 %v2549_v35 }
 0x28f   : > { %v1981_v52 = vsel %vm304_vm0, %v1978_v48, %v1979_v51  ;;  %v1984_v7 = vsel %vm304_vm0, %v1979_v51, %v1980_v26 }
 0x290   : > { %v1983_v14 = vsel %vm1982_vm8, %v3305_v41, %v1981_v52  ;;  %v1985_v28 = vsel %vm1982_vm8, %v1975_v38, %v1984_v7  ;;  %v1936_v59 = vsel %vm304_vm0, %v1931_v55, %v1932_v47  ;;  %v1951_v58 = vpop.permute.xlu1 %1950  ;;  %v1884_v41 = vrot.slane %v3491_v36, 4 }
 0x291   : > { %2565 = vmatmul.mubr.msk.bf16.vlgmr.msra.gmra.mxu1 %vm728_vm13, %v1686_v31  ;;  %v1879_v61 = vpop.permute.xlu0 %1878  ;;  %v2578_v10 = vcombine.high %v1983_v14, %v1983_v14  ;;  %v2579_v54 = vcombine.low %v1985_v28, %v1985_v28  ;;  %v2580_v6 = vcombine.high %v1985_v28, %v1985_v28  ;;  %2562 = vmatmul.mubr.msk.bf16.vlgmr.msra.gmra.mxu0 %vm728_vm13, %v1686_v31  ;;  %v1955_v16 = vrot.slane %v1951_v58, 4 }
 0x292   : > { %1849 = vmatprep.mubr.bf16.mxu1 %v2844_v0  ;;  %v1883_v20 = vrot.slane %v1879_v61, 4  ;;  %v2577_v13 = vcombine.low %v1983_v14, %v1983_v14  ;;  %1798 = vmatprep.mubr.bf16.mxu0 %v2844_v0  ;;  %v1933_v53 = vsel %vm304_vm0, %v1930_v46, %v1931_v55  ;;  %v1937_v15 = vsel %vm1934_vm9, %v1927_v18, %v1936_v59 }
 0x293   : > { %v1957_v25 = vsel %vm304_vm0, %v1954_v37, %v1955_v16  ;;  %v1960_v22 = vsel %vm304_vm0, %v1955_v16, %v1956_v9  ;;  %2581 = vmatprep.subr.msk.bf16.mxu0 %vm304_vm0, %v2578_v10  ;;  %2584 = vmatprep.subr.msk.bf16.mxu1 %vm304_vm0, %v2580_v6  ;;  %v2078_v50 = vsel %vm304_vm0, %v2579_v54, 0  ;;  %v1935_v5 = vsel %vm1934_vm9, %v3379_v63, %v1933_v53 }
 0x294   : > { %v1961_v17 = vsel %vm1958_vm14, %v1951_v58, %v1960_v22  ;;  %v1903_v3 = vpop.permute.xlu1 %1902  ;;  %v2072_v44 = vsel %vm304_vm0, %v2577_v13, 0  ;;  %2145 = vmatpush1.bf16.msra.mxu1 %v2078_v50  ;;  %v1888_v33 = vsel %vm304_vm0, %v1883_v20, %v1884_v41  ;;  %v1885_v4 = vsel %vm304_vm0, %v1882_v62, %v1883_v20 }
 0x295   : > { %v1684_v1 = vpop.permute.xlu0 %1683  ;;  %v2575_v42 = vcombine.low %v1937_v15, %v1961_v17  ;;  %v2576_v11 = vcombine.high %v1937_v15, %v1961_v17  ;;  %v1907_v57 = vrot.slane %v1903_v3, 4  ;;  %2094 = vmatpush1.bf16.msra.mxu0 %v2072_v44  ;;  %v1959_v45 = vsel %vm1958_vm14, %v3387_v30, %v1957_v25 }
 0x296   : > { %v2573_v39 = vcombine.low %v1935_v5, %v1959_v45  ;;  %v2574_v36 = vcombine.high %v1935_v5, %v1959_v45  ;;  %v1889_v29 = vsel %vm1886_vm3, %v1879_v61, %v1888_v33  ;;  %v1887_v43 = vsel %vm1886_vm3, %v3451_v24, %v1885_v4 }
 0x297   : > { %v1909_v8 = vsel %vm304_vm0, %v1906_v12, %v1907_v57  ;;  %v1912_v60 = vsel %vm304_vm0, %v1907_v57, %v1908_v2  ;;  %2146 = vmatprep.subr.bf16.mxu1 %v2576_v11 }
 0x298   : > { %v1913_v49 = vsel %vm1910_vm4, %v1903_v3, %v1912_v60  ;;  %v1682_v21 = vpop.permute.xlu1 %1681  ;;  %2147 = vmatpush1.bf16.msra.mxu1 %v2575_v42  ;;  %v1911_v63 = vsel %vm1910_vm4, %v3477_v40, %v1909_v8  ;;  %2095 = vmatprep.subr.bf16.mxu0 %v2574_v36  ;;  %v556_v36 = vld [vmem:[%s3847_s5 + $0x10] sm:$0xff] }
 0x299   : > { %v2224_v34 = vpop.permute.xlu0 %2223  ;;  %v2571_v32 = vcombine.low %v1889_v29, %v1913_v49  ;;  %v2572_v35 = vcombine.high %v1889_v29, %v1913_v49  ;;  %v1687_v30 = vsel %vm300_vm1, %v1682_v21, %v1684_v1  ;;  %2096 = vmatpush1.bf16.msra.mxu0 %v2573_v39  ;;  %v2569_v38 = vcombine.low %v1887_v43, %v1911_v63 }
 0x29a   : > { %2566 = vmatmul.mubr.msk.bf16.gmra.mxu1 %vm728_vm13, %v1687_v30  ;;  %v2570_v18 = vcombine.high %v1887_v43, %v1911_v63  ;;  %2563 = vmatmul.mubr.msk.bf16.gmra.mxu0 %vm728_vm13, %v1687_v30  ;;  %v2229_v55 = vrot.slane %v2224_v34, 4  ;;  %vm2272_vm1 = vcmask 7168   ;;  %v555_v30 = vld [vmem:[%s3847_s5 + $0x8] sm:$0xff] }
 0x29b   : > { %2148 = vmatprep.subr.bf16.mxu1 %v2572_v35  ;;  %2115 = vmatprep.mubr.bf16.mxu0 %v2844_v0 }
 0x29c   : > { %2097 = vmatprep.subr.bf16.mxu0 %v2570_v18  ;;  %v2012_v48 = vpop.permute.xlu1 %2011  ;;  %2149 = vmatpush1.bf16.msra.mxu1 %v2571_v32 }
 0x29d   : > { %v2228_v40 = vpop.permute.xlu0 %2227  ;;  %2166 = vmatprep.mubr.bf16.mxu1 %v2844_v0  ;;  %2098 = vmatpush1.bf16.msra.mxu0 %v2569_v38 }
 0x29e   : > { %v2231_v31 = vrot.slane %v2228_v40, 4  ;;  %v2241_v41 = vmax.bf16 %v2228_v40, %v3247_v23 }
 0x2a0   : > { %v2226_v26 = vpop.permute.xlu1 %2225 }
 0x2a1   : > { %v2243_v51 = vpop.permute.xlu0 %2242  ;;  %v2230_v24 = vrot.slane %v2226_v26, 4 }
 0x2a2   : > { %2585 = vmatmul.mubr.msk.bf16.vlgmr.msra.gmra.mxu1 %vm728_vm13, %v2012_v48  ;;  %2582 = vmatmul.mubr.msk.bf16.vlgmr.msra.gmra.mxu0 %vm728_vm13, %v2012_v48  ;;  %v2248_v14 = vrot.slane %v2243_v51, 4 }
 0x2a3   : > { %2176 = vmatprep.mubr.bf16.mxu1 %v2844_v0  ;;  %2125 = vmatprep.mubr.bf16.mxu0 %v2844_v0  ;;  %v2232_v47 = vsel %vm304_vm0, %v2229_v55, %v2230_v24  ;;  %v2234_v37 = vsel %vm304_vm0, %v2230_v24, %v2231_v31 }
 0x2a4   : > { %v2014_v46 = vpop.permute.xlu1 %2013  ;;  %v2235_v52 = vsel %vm577_vm11, %v2226_v26, %v2234_v37  ;;  %v2233_v62 = vsel %vm577_vm11, %v2224_v34, %v2232_v47 }
 0x2a5   : > { %v2247_v9 = vpop.permute.xlu0 %2246  ;;  %v2240_v58 = vmax.bf16 %v2235_v52, %v3258_v27  ;;  %v2239_v10 = vmax.bf16 %v2233_v62, %v3240_v19 }
 0x2a6   : > { %v2250_v28 = vrot.slane %v2247_v9, 4  ;;  %v2260_v27 = vmax.bf16 %v2247_v9, %v2241_v41 }
 0x2a8   : > { %v2245_v7 = vpop.permute.xlu1 %2244 }
 0x2a9   : > { %v2249_v59 = vrot.slane %v2245_v7, 4 }
 0x2aa   : > { %2586 = vmatmul.mubr.msk.bf16.gmra.mxu1 %vm728_vm13, %v2014_v46  ;;  %2583 = vmatmul.mubr.msk.bf16.gmra.mxu0 %vm728_vm13, %v2014_v46 }
 0x2ab   : > { %v2251_v61 = vsel %vm304_vm0, %v2248_v14, %v2249_v59  ;;  %v2253_v0 = vsel %vm304_vm0, %v2249_v59, %v2250_v28 }
 0x2ac   : > { %v2254_v54 = vsel %vm601_vm10, %v2245_v7, %v2253_v0  ;;  %v2252_v6 = vsel %vm601_vm10, %v2243_v51, %v2251_v61 }
 0x2ad   : > { %v2259_v16 = vmax.bf16 %v2254_v54, %v2240_v58  ;;  %v2258_v12 = vmax.bf16 %v2252_v6, %v2239_v10 }
 0x2af   : > { %2264 = vrot.lane.b32.xlu1 %v2258_v12, %s2873_s14  ;;  %2266 = vrot.lane.b32.xlu0 %v2259_v16, %s2873_s14 }
 0x2b3   : > { %2268 = vrot.lane.b32.xlu1 %v2260_v27, %s2873_s14  ;;  %2286 = vrot.lane.b32.xlu0 %v2258_v12, %s2874_s15 }
 0x2b7   : > { %2288 = vrot.lane.b32.xlu1 %v2259_v16, %s2874_s15  ;;  %2290 = vrot.lane.b32.xlu0 %v2260_v27, %s2874_s15 }
 0x31f   : > { %v3571_v20 = vpop.f32.mrf.mxu1 }
 0x320   : > { %v3573_v19 = vpop.f32.mrf.mxu0 }
 0x321   : > { %v3575_v13 = vpop.f32.mrf.mxu1  ;;  %v2265_v53 = vpop.permute.xlu1 %2264 }
 0x322   : > { %v3577_v25 = vpop.f32.mrf.mxu0  ;;  %v2270_v23 = vrot.slane %v2265_v53, 4  ;;  %v2267_v22 = vpop.permute.xlu0 %2266 }
 0x323   : > { %v2271_v50 = vrot.slane %v2267_v22, 4  ;;  %v3579_v2 = vpop.f32.mrf.mxu1 }
 0x324   : > { %v2273_v15 = vsel %vm2272_vm1, %v2270_v23, %v2265_v53  ;;  %v3581_v17 = vpop.f32.mrf.mxu0 }
 0x325   : > { %2280 = vst.msk [vmem:[#allocation3] sm:$0xff] %vm3056_vm7, %v2273_v15  ;;  %v2274_v3 = vsel %vm304_vm0, %v2270_v23, %v2271_v50  ;;  %v3586_v44 = vpop.f32.mrf.mxu1  ;;  %v2269_v1 = vpop.permute.xlu1 %2268 }
 0x326   : > { %v3588_v42 = vsel %vm2272_vm1, %v2274_v3, %v2267_v22  ;;  %v3590_v11 = vpop.f32.mrf.mxu0  ;;  %v2276_v33 = vsel %vm2272_vm1, %v2271_v50, %v2269_v1 }
 0x327   : > { %2282 = vst.msk [vmem:[#allocation3 + $0x10] sm:$0xf] %vm428_vm2, %v2276_v33  ;;  %v3593_v57 = vpop.f32.mrf.mxu1  ;;  %2311 = vrot.lane.b32.xlu0 %v3588_v42, %s3897_s26  ;;  %vm2296_vm2 = vcmask 891904  }
 0x328   : > { %v3597_v4 = vpop.f32.mrf.mxu0 }
 0x329   : > { %v3602_v5 = vpop.f32.mrf.mxu1 }
 0x32a   : > { %v3604_v45 = vpop.f32.mrf.mxu0 }
 0x32b   : > { %v846_v8 = vpop.f32.mrf.mxu1  ;;  %851 = vperm.xlu0 %2689, %v554_v56  }
 0x32c   : > { %v795_v60 = vpop.f32.mrf.mxu0  ;;  %v3606_v39 = vld [vmem:[#allocation3] sm:$0xff] }
 0x32d   : > { %v847_v29 = vpop.f32.mrf.mxu1  ;;  %2309 = vrot.lane.b32.xlu1 %v3606_v39, %s3897_s26 }
 0x32e   : > { %v796_v49 = vpop.f32.mrf.mxu0  ;;  %v3613_v21 = vld [vmem:[#allocation3 + $0x10] sm:$0xf] }
 0x32f   : > { %861 = vperm.xlu0 %2689, %v556_v36  }
 0x330   : > { %v3615_v34 = vpop.f32.mrf.mxu0  ;;  %v3617_v63 = vpop.f32.mrf.mxu1 }
 0x331   : > { %2313 = vrot.lane.b32.xlu1 %v3613_v21, %s3897_s26 }
 0x332   : > { %v3621_v32 = vpop.f32.mrf.mxu0  ;;  %v3623_v35 = vpop.f32.mrf.mxu1 }
 0x334   : > { %v3628_v43 = vpop.f32.mrf.mxu0  ;;  %v3630_v38 = vpop.f32.mrf.mxu1 }
 0x335   : > { %856 = vperm.xlu1 %2690, %v555_v30  }
 0x336   : > { %v3632_v18 = vpop.f32.mrf.mxu0  ;;  %v3634_v48 = vpop.f32.mrf.mxu1 }
 0x338   : > { %v3636_v40 = vpop.f32.mrf.mxu0  ;;  %v3638_v26 = vpop.f32.mrf.mxu1 }
 0x33a   : > { %v3640_v51 = vpop.f32.mrf.mxu0  ;;  %v3642_v24 = vpop.f32.mrf.mxu1 }
 0x33c   : > { %v1138_v55 = vpop.f32.mrf.mxu0  ;;  %v1189_v31 = vpop.f32.mrf.mxu1 }
 0x33e   : > { %v1139_v46 = vpop.f32.mrf.mxu0  ;;  %v1190_v47 = vpop.f32.mrf.mxu1 }
 0x341   : > { %v3644_v37 = vpop.f32.mrf.mxu1  ;;  %v3646_v9 = vpop.f32.mrf.mxu0 }
 0x343   : > { %v3648_v52 = vpop.f32.mrf.mxu1  ;;  %v3650_v7 = vpop.f32.mrf.mxu0 }
 0x345   : > { %v3652_v62 = vpop.f32.mrf.mxu1  ;;  %v3654_v14 = vpop.f32.mrf.mxu0 }
 0x347   : > { %v3656_v28 = vpop.f32.mrf.mxu1  ;;  %v3658_v59 = vpop.f32.mrf.mxu0 }
 0x349   : > { %v3660_v58 = vpop.f32.mrf.mxu1  ;;  %v3662_v61 = vpop.f32.mrf.mxu0 }
 0x34a   : > { %3902 = vst [vmem:[#allocation14_spill] sm:$0xff] %v3660_v58 }
 0x34b   : > { %v3664_v0 = vpop.f32.mrf.mxu1  ;;  %v3666_v10 = vpop.f32.mrf.mxu0 }
 0x34c   : > { %3903 = vst [vmem:[#allocation15_spill] sm:$0xff] %v3664_v0  ;;  %3904 = vst [vmem:[#allocation16_spill] sm:$0xff] %v3666_v10 }
 0x34d   : > { %v1516_v54 = vpop.f32.mrf.mxu1  ;;  %v1465_v6 = vpop.f32.mrf.mxu0 }
 0x34f   : > { %v1517_v16 = vpop.f32.mrf.mxu1  ;;  %v1466_v12 = vpop.f32.mrf.mxu0 }
 0x351   : > { %v3668_v41 = vpop.f32.mrf.mxu1  ;;  %v3670_v27 = vpop.f32.mrf.mxu0 }
 0x352   : > { %3905 = vst [vmem:[#allocation17_spill] sm:$0xff] %v3668_v41 }
 0x353   : > { %v3672_v53 = vpop.f32.mrf.mxu1  ;;  %v3674_v23 = vpop.f32.mrf.mxu0 }
 0x354   : > { %3906 = vst [vmem:[#allocation18_spill] sm:$0xff] %v3672_v53  ;;  %3907 = vst [vmem:[#allocation19_spill] sm:$0xff] %v3674_v23 }
 0x355   : > { %v3676_v22 = vpop.f32.mrf.mxu1  ;;  %v3678_v50 = vpop.f32.mrf.mxu0 }
 0x357   : > { %v3680_v15 = vpop.f32.mrf.mxu1  ;;  %v3682_v3 = vpop.f32.mrf.mxu0 }
 0x35a   : > { %v3684_v1 = vpop.f32.mrf.mxu1  ;;  %v3686_v33 = vpop.f32.mrf.mxu0 }
 0x35b   : > { %3908 = vst [vmem:[#allocation20_spill] sm:$0xff] %v3684_v1  ;;  %3909 = vst [vmem:[#allocation21_spill] sm:$0xff] %v3686_v33  ;;  %v2289_v1 = vpop.permute.xlu1 %2288 }
 0x35c   : > { %v3688_v56 = vpop.f32.mrf.mxu1  ;;  %v3690_v8 = vpop.f32.mrf.mxu0 }
 0x35d   : > { %3910 = vst [vmem:[#allocation22_spill] sm:$0xff] %v3688_v56  ;;  %3911 = vst [vmem:[#allocation23_spill] sm:$0xff] %v3690_v8  ;;  %v2293_v8 = vrot.slane %v2289_v1, 4 }
 0x35e   : > { %v1855_v60 = vpop.f32.mrf.mxu1  ;;  %v1804_v36 = vpop.f32.mrf.mxu0 }
 0x360   : > { %v1856_v29 = vpop.f32.mrf.mxu1  ;;  %v1805_v49 = vpop.f32.mrf.mxu0 }
 0x362   : > { %v3692_v30 = vpop.f32.mrf.mxu1  ;;  %v3694_v55 = vpop.f32.mrf.mxu0 }
 0x363   : > { %3912 = vst [vmem:[#allocation24_spill] sm:$0xff] %v3692_v30  ;;  %3913 = vst [vmem:[#allocation25_spill] sm:$0xff] %v3694_v55 }
 0x364   : > { %v3696_v31 = vpop.f32.mrf.mxu1  ;;  %v3698_v46 = vpop.f32.mrf.mxu0 }
 0x365   : > { %3914 = vst [vmem:[#allocation26_spill] sm:$0xff] %v3696_v31  ;;  %3915 = vst [vmem:[#allocation27_spill] sm:$0xff] %v3698_v46  ;;  %v2287_v46 = vpop.permute.xlu0 %2286 }
 0x366   : > { %v3700_v47 = vpop.f32.mrf.mxu1  ;;  %v3702_v54 = vpop.f32.mrf.mxu0  ;;  %v2292_v53 = vrot.slane %v2287_v46, 4 }
 0x367   : > { %3916 = vst [vmem:[#allocation28_spill] sm:$0xff] %v3700_v47 }
 0x368   : > { %v3704_v6 = vpop.f32.mrf.mxu1  ;;  %v3706_v16 = vpop.f32.mrf.mxu0 }
 0x369   : > { %3917 = vst [vmem:[#allocation29_spill] sm:$0xff] %v3704_v6  ;;  %3918 = vst [vmem:[#allocation30_spill] sm:$0xff] %v3706_v16  ;;  %v2291_v47 = vpop.permute.xlu0 %2290  ;;  %v2295_v6 = vsel %vm304_vm0, %v2292_v53, %v2293_v8 }
 0x36a   : > { %v3708_v12 = vpop.f32.mrf.mxu1  ;;  %v3710_v60 = vpop.f32.mrf.mxu0  ;;  %v2294_v16 = vrot.slane %v2291_v47, 4  ;;  %v2297_v55 = vsel %vm2296_vm2, %v2287_v46, %v2295_v6  ;;  %v2305_v53 = vmax.bf16 %v2291_v47, %v3613_v21 }
 0x36b   : > { %3919 = vst [vmem:[#allocation31_spill] sm:$0xff] %v3708_v12  ;;  %3920 = vst [vmem:[#allocation32_spill] sm:$0xff] %v3710_v60 }
 0x36c   : > { %v3712_v36 = vpop.f32.mrf.mxu1  ;;  %v3714_v29 = vpop.f32.mrf.mxu0 }
 0x36d   : > { %3921 = vst [vmem:[#allocation33_spill] sm:$0xff] %v3712_v36  ;;  %3922 = vst [vmem:[#allocation34_spill] sm:$0xff] %v3714_v29  ;;  %v2298_v36 = vsel %vm304_vm0, %v2293_v8, %v2294_v16 }
 0x36e   : > { %v2182_v49 = vpop.f32.mrf.mxu1  ;;  %v2131_v31 = vpop.f32.mrf.mxu0 }
 0x36f   : > { %v2303_v31 = vmax.bf16 %v2297_v55, %v3606_v39 }
 0x370   : > { %v2183_v56 = vpop.f32.mrf.mxu1  ;;  %v2132_v30 = vpop.f32.mrf.mxu0 }
 0x371   : > { %v2299_v30 = vsel %vm2296_vm2, %v2289_v1, %v2298_v36 }
 0x372   : > { %v2304_v10 = vmax.bf16 %v2299_v30, %v3588_v42 }
 0x399   : > { %v2312_v12 = vpop.permute.xlu0 %2311 }
 0x39a   : > { %v2316_v29 = vrot.slane %v2312_v12, 4 }
 0x39f   : > { %v2310_v60 = vpop.permute.xlu1 %2309 }
 0x3a0   : > { %v2315_v0 = vrot.slane %v2310_v60, 4 }
 0x3a2   : > { %v2318_v56 = vsel %vm304_vm0, %v2315_v0, %v2316_v29 }
 0x3a3   : > { %v2319_v49 = vsel %vm1220_vm12, %v2310_v60, %v2318_v56  ;;  %v2314_v41 = vpop.permute.xlu1 %2313 }
 0x3a4   : > { %v2325_v33 = vmax.bf16 %v2319_v49, %v2303_v31  ;;  %v2317_v58 = vrot.slane %v2314_v41, 4  ;;  %v2327_v39 = vmax.bf16 %v2314_v41, %v2305_v53  ;;  %v3923_v49 = vld [vmem:[#allocation19_spill] sm:$0xff]  ;;  %v3924_v53 = vld [vmem:[#allocation16_spill] sm:$0xff] }
 0x3a6   : > { %v2320_v46 = vsel %vm304_vm0, %v2316_v29, %v2317_v58  ;;  %v2328_v6 = vunpack.c.l.bf16 %v2325_v33  ;;  %v2329_v8 = vunpack.c.h.bf16 %v2325_v33  ;;  %v2332_v60 = vunpack.c.l.bf16 %v2327_v39  ;;  %v852_v42 = vpop.permute.xlu0 %851 }
 0x3a7   : > { %v2321_v16 = vsel %vm1220_vm12, %v2312_v12, %v2320_v46  ;;  %v864_v33 = vadd.f32 %v852_v42, %v3573_v19  ;;  %v865_v29 = vadd.f32 %v852_v42, %v3577_v25  ;;  %v866_v56 = vadd.f32 %v852_v42, %v3571_v20  ;;  %v3925_v46 = vld [vmem:[#allocation14_spill] sm:$0xff] }
 0x3a8   : > { %v2326_v23 = vmax.bf16 %v2321_v16, %v2304_v10  ;;  %v2691_v55 = vpack.i.bf16 %v2329_v8, %v2328_v6  ;;  %v867_v30 = vadd.f32 %v852_v42, %v3575_v13  ;;  %v3926_v6 = vld [vmem:[#allocation21_spill] sm:$0xff]  ;;  %v3928_v16 = vld [vmem:[#allocation15_spill] sm:$0xff] }
 0x3a9   : > { %v1194_v13 = vadd.f32 %v3617_v63, %v866_v56  ;;  %v3927_v8 = vld [vmem:[#allocation17_spill] sm:$0xff] }
 0x3aa   : > { %2692 = vrot.lane.b32.xlu1 %v2691_v55, %s3895_s19  ;;  %v2330_v0 = vunpack.c.l.bf16 %v2326_v23  ;;  %v2331_v1 = vunpack.c.h.bf16 %v2326_v23  ;;  %v862_v47 = vpop.permute.xlu0 %861 }
 0x3ab   : > { %v872_v31 = vadd.f32 %v862_v47, %v3597_v4  ;;  %v873_v25 = vadd.f32 %v862_v47, %v3604_v45  ;;  %v874_v4 = vadd.f32 %v862_v47, %v3593_v57 }
 0x3ac   : > { %v2696_v36 = vpack.i.bf16 %v2331_v1, %v2330_v0  ;;  %v3931_v0 = vld [vmem:[#allocation30_spill] sm:$0xff]  ;;  %v3932_v1 = vld [vmem:[#allocation28_spill] sm:$0xff] }
 0x3ad   : > { %v1200_v20 = vadd.f32 %v3636_v40, %v872_v31  ;;  %v1201_v40 = vadd.f32 %v3640_v51, %v873_v25  ;;  %v1202_v63 = vadd.f32 %v3638_v26, %v874_v4  ;;  %v3938_v31 = vld [vmem:[#allocation24_spill] sm:$0xff] }
 0x3ae   : > { %2697 = vrot.lane.b32.xlu0 %v2696_v36, %s3895_s19  ;;  %2346 = vrot.lane.b32.xlu1 %v2332_v60, %s3895_s19  ;;  %v3933_v36 = vld [vmem:[#allocation29_spill] sm:$0xff]  ;;  %s270_s19 = sand.u32 1, %s2830_s22  }
 0x3af   : > { %s2469_s26 = sshll.u32 %s270_s19, 5  ;;  %s2366_s14 = scalar_lea.sflag [#allocation7], %s270_s19 }
 0x3b0   : > { %v857_v21 = vpop.permute.xlu1 %856  ;;  %s272_s18 = scalar_lea.vmem [#allocation10], %s2469_s26 }
 0x3b1   : > { %v868_v58 = vadd.f32 %v857_v21, %v3581_v17  ;;  %v869_v10 = vadd.f32 %v857_v21, %v3590_v11  ;;  %v870_v41 = vadd.f32 %v857_v21, %v3579_v2  ;;  %v871_v12 = vadd.f32 %v857_v21, %v3586_v44  ;;  %v3934_v21 = vld [vmem:[#allocation23_spill] sm:$0xff]  ;;  %s2380_s10 = sshll.u32 %s272_s18, 4  ;;  %s3801_s10 = int_to_ptr.vmem [resolvable:$true] %s2380_s10 }
 0x3b2   : > { %v1192_v17 = vadd.f32 %v3615_v34, %v864_v33  ;;  %v1195_v34 = vadd.f32 %v3623_v35, %v867_v30  ;;  %v1527_v35 = vadd.f32 %v3662_v61, %v1200_v20  ;;  %v1528_v61 = vadd.f32 %v3924_v53, %v1201_v40  ;;  %v3935_v33 = vld [vmem:[#allocation20_spill] sm:$0xff]  ;;  %v3939_v30 = vld [vmem:[#allocation22_spill] sm:$0xff]  ;;  %s2770_s15 = scalar_lea.vmem %s3801_s10, 512  ;;  %p2777_p8 = scmp.lt.s32.totalorder %s3801_s10, %s2775_s20 }
 0x3b3   : > { %v1196_v23 = vadd.f32 %v3628_v43, %v868_v58  ;;  %v1197_v19 = vadd.f32 %v3632_v18, %v869_v10  ;;  %v1198_v11 = vadd.f32 %v3630_v38, %v870_v41  ;;  %v1199_v2 = vadd.f32 %v3634_v48, %v871_v12  ;;  %v3936_v10 = vld [vmem:[#allocation32_spill] sm:$0xff]  ;;  %v3937_v12 = vld [vmem:[#allocation27_spill] sm:$0xff]  ;;  %v3941_v20 = vld [vmem:[#allocation34_spill] sm:$0xff]  ;;  %p2771_p12 = scmp.ne.s32.totalorder %s3801_s10, %s2770_s15  ;;  %p2778_p11 = scmp.lt.s32.totalorder %s2776_s17, %s2770_s15 }
 0x3b4   : > { %v1193_v43 = vadd.f32 %v3621_v32, %v865_v29  ;;  %v1519_v18 = vadd.f32 %v3646_v9, %v1192_v17  ;;  %v875_v38 = vadd.f32 %v862_v47, %v3602_v5  ;;  %v1521_v9 = vadd.f32 %v3644_v37, %v1194_v13 }
 0x3b5   : > { %v1523_v44 = vadd.f32 %v3654_v14, %v1196_v23  ;;  %v1524_v48 = vadd.f32 %v3658_v59, %v1197_v19  ;;  %v1525_v14 = vadd.f32 %v3652_v62, %v1198_v11  ;;  %v1526_v32 = vadd.f32 %v3656_v28, %v1199_v2  ;;  %v3940_v19 = vld [vmem:[#allocation26_spill] sm:$0xff]  ;;  %p2772_p4 = pnand %p2771_p12, %p3944_p13  ;;  %p2779_p0 = por %p2778_p11, %p2777_p8 }
 0x3b6   : > { %v1520_v57 = vadd.f32 %v3650_v7, %v1193_v43  ;;  %v1522_v5 = vadd.f32 %v3648_v52, %v1195_v34  ;;  %v1858_v59 = vadd.f32 %v3670_v27, %v1519_v18  ;;  %v1203_v62 = vadd.f32 %v3642_v24, %v875_v38  ;;  %v3942_v34 = vld [vmem:[#allocation31_spill] sm:$0xff] }
 0x3b7   : > { %v1862_v45 = vadd.f32 %v3678_v50, %v1523_v44  ;;  %v1863_v28 = vadd.f32 %v3682_v3, %v1524_v48  ;;  %v1864_v50 = vadd.f32 %v3676_v22, %v1525_v14  ;;  %v1865_v51 = vadd.f32 %v3680_v15, %v1526_v32  ;;  %v3929_v3 = vld [vmem:[#allocation25_spill] sm:$0xff]  ;;  %v3930_v22 = vld [vmem:[#allocation18_spill] sm:$0xff]  ;;  %p2773_p7 = pneg %p2772_p4 }
 0x3b8   : > { %v1859_v26 = vadd.f32 %v3923_v49, %v1520_v57  ;;  %v1529_v37 = vadd.f32 %v3925_v46, %v1202_v63  ;;  %v1866_v52 = vadd.f32 %v3926_v6, %v1527_v35  ;;  %v1860_v27 = vadd.f32 %v3927_v8, %v1521_v9  ;;  %v3943_v32 = vld [vmem:[#allocation33_spill] sm:$0xff] }
 0x3b9   : > { %v2189_v7 = vadd.f32 %v3702_v54, %v1862_v45  ;;  %v1530_v24 = vadd.f32 %v3928_v16, %v1203_v62  ;;  %v2185_v39 = vadd.f32 %v3929_v3, %v1858_v59  ;;  %v1861_v55 = vadd.f32 %v3930_v22, %v1522_v5  ;;  %p2780_p1 = pnand %p2779_p0, %p2773_p7 }
 0x3ba   : > { %v2190_v15 = vadd.f32 %v3931_v0, %v1863_v28  ;;  %v2191_v60 = vadd.f32 %v3932_v1, %v1864_v50  ;;  %v2192_v42 = vadd.f32 %v3933_v36, %v1865_v51  ;;  %v1867_v58 = vadd.f32 %v3934_v21, %v1528_v61 }
 0x3bb   : > { %v2201_v54 = vmax.f32 %v2189_v7, 0.0  ;;  %v1868_v47 = vadd.f32 %v3935_v33, %v1529_v37  ;;  %v2193_v41 = vadd.f32 %v3936_v10, %v1866_v52  ;;  %v2186_v23 = vadd.f32 %v3937_v12, %v1859_v26 }
 0x3bc   : > { %v2197_v29 = vmax.f32 %v2185_v39, 0.0  ;;  %v2187_v56 = vadd.f32 %v3938_v31, %v1860_v27  ;;  %v1869_v17 = vadd.f32 %v3939_v30, %v1530_v24  ;;  %v2188_v11 = vadd.f32 %v3940_v19, %v1861_v55 }
 0x3bd   : > { %v2202_v44 = vmax.f32 %v2190_v15, 0.0  ;;  %v2203_v43 = vmax.f32 %v2191_v60, 0.0  ;;  %v2204_v25 = vmax.f32 %v2192_v42, 0.0  ;;  %v2209_v4 = vmax.f32 %v2193_v41, 0.0 }
 0x3be   : > { %v2205_v2 = vadd.f32 %v2201_v54, %v2197_v29  ;;  %v2194_v13 = vadd.f32 %v3941_v20, %v1867_v58  ;;  %v2195_v18 = vadd.f32 %v3942_v34, %v1868_v47  ;;  %v2198_v48 = vmax.f32 %v2186_v23, 0.0 }
 0x3bf   : > { %v2199_v14 = vmax.f32 %v2187_v56, 0.0  ;;  %v2196_v45 = vadd.f32 %v3943_v32, %v1869_v17  ;;  %v2200_v57 = vmax.f32 %v2188_v11, 0.0 }
 0x3c0   : > { %v2213_v35 = vadd.f32 %v2209_v4, %v2205_v2  ;;  %v2206_v9 = vadd.f32 %v2202_v44, %v2198_v48  ;;  %v2210_v50 = vmax.f32 %v2194_v13, 0.0  ;;  %v2211_v7 = vmax.f32 %v2195_v18, 0.0 }
 0x3c1   : > { %v2207_v5 = vadd.f32 %v2203_v43, %v2199_v14  ;;  %v2208_v59 = vadd.f32 %v2204_v25, %v2200_v57  ;;  %v2212_v49 = vmax.f32 %v2196_v45, 0.0 }
 0x3c2   : > { %v2214_v61 = vadd.f32 %v2210_v50, %v2206_v9 }
 0x3c3   : > { %v2215_v46 = vadd.f32 %v2211_v7, %v2207_v5  ;;  %v2216_v6 = vadd.f32 %v2212_v49, %v2208_v59 }
 0x41c   : > { %v2693_v38 = vpop.permute.xlu1 %2692 }
 0x41d   : > { %v2695_v40 = vunpack.i.h.bf16 %v2693_v38  ;;  %v2694_v63 = vunpack.i.l.bf16 %v2693_v38 }
 0x41f   : > { %v2349_v62 = vsel %vm941_vm15, %v2694_v63, %v2695_v40 }
 0x420   : > { %v2357_v28 = vadd.f32 %v2349_v62, %v2213_v35  ;;  %v2698_v51 = vpop.permute.xlu0 %2697  ;;  %v2347_v37 = vpop.permute.xlu1 %2346 }
 0x421   : > { %v2700_v26 = vunpack.i.h.bf16 %v2698_v51  ;;  %v2699_v53 = vunpack.i.l.bf16 %v2698_v51 }
 0x422   : > { %2361 = vst [vmem:[%s272_s18] sm:$0xff] %v2357_v28 }
 0x423   : > { %v2350_v52 = vsel %vm941_vm15, %v2695_v40, %v2699_v53  ;;  %v2351_v8 = vsel %vm941_vm15, %v2699_v53, %v2700_v26  ;;  %v2352_v27 = vsel %vm941_vm15, %v2700_v26, %v2347_v37 }
 0x424   : > { %v2358_v16 = vadd.f32 %v2350_v52, %v2214_v61  ;;  %v2359_v24 = vadd.f32 %v2351_v8, %v2215_v46  ;;  %v2360_v3 = vadd.f32 %v2352_v27, %v2216_v6 }
 0x426   : > { %2362 = vst [vmem:[%s272_s18 + $0x8] sm:$0xff] %v2358_v16  ;;  %2363 = vst [vmem:[%s272_s18 + $0x10] sm:$0xff] %v2359_v24 }
 0x427   : > { %2364 = vst [vmem:[%s272_s18 + $0x18] sm:$0xff] %v2360_v3 }
 0x428   : > { %2783 = shalt.err (!%p2780_p1)
}
 0x429   : > { %s2784_s9 = scalar_lea.hbm %s3799_s13, 512  ;;  %s2788_s19 = scalar_lea.hbm %s3848_s6, 1024 }
 0x42a   : > { %p2785_p2 = scmp.ne.s32.totalorder %s3799_s13, %s2784_s9  ;;  %p2789_p5 = scmp.lt.s32.totalorder %s3799_s13, %s3848_s6 }
 0x42b   : > { %p2790_p6 = scmp.lt.s32.totalorder %s2788_s19, %s2784_s9 }
 0x42c   : > { %p2786_p3 = pnand %p2785_p2, %p3944_p13 }
 0x42d   : > { %p2791_p10 = por %p2790_p6, %p2789_p5 }
 0x42e   : > { %p2787_p9 = pneg %p2786_p3 }
 0x430   : > { %p2792_p12 = pnand %p2791_p10, %p2787_p9 }
 0x432   : > { %2795 = shalt.err (!%p2792_p12)
}
 0x433   : > { %2604 = dma.vmem_to_hbm [thread:$0]  (%p3944_p13), %s3801_s10, 512, %s3799_s13, %s2366_s14  }
 0x434 PF: > { %p2621_p4 = scmp.ge.s32.totalorder %s2838_s24, 2  ;;  %s2392_s18 = sand.u32 1, %s2826_s21  }
 0x435   : > { %p3945_p7 = scmp.ne.s32.totalorder %s3877_s8, 0  ;;  %s2393_s12 = scalar_lea.sflag [#allocation7], %s2392_s18 }
 0x437   : > { %p2614_p8 = pnand %p2621_p4, %p3945_p7 }
 0x439   : > { %p2615_p11 = pneg %p2614_p8 }
 0x43b   : > { %2821 = dma.done.wait (%p2615_p11), %s2393_s12, 512  }
 0x43c   : > { %2823 = vsyncadd (%p2615_p11), %s2393_s12, 4294966784  ;;  %p18_p0 = scmp.ge.s32.totalorder %s2936_s27, 4   ;;  %s3946_s21 = smov %s2830_s22 }
 0x43d   : > { %s3947_s22 = smov %s2834_s23  ;;  %s3948_s23 = smov %s2947_s30 }
 0x43e   : > { %s3949_s24 = smov %s2936_s27  ;;  %20 = sbr.rel (!%p18_p0) target bundleno = 5 (0x5), region = 89 }
 0x443   :  { %2398 = vsyncpa [#allocation6], 1 }
 0x444   :  { %2400 = vsyncpa [#allocation6 + $0x1], 1 }
 0x445   :  { %2401 = vsyncpa [#allocation9], 1 }
 0x446   :  { %2402 = vsyncpa [#allocation7], 1 }
 0x447   :  { %2404 = vsyncpa [#allocation7 + $0x1], 1 }

</bundles_post_ra>
